<compile_context>
chip_gen: v7x
topology: tpu7x:2x2x1
jax: 0.10.0
libtpu: 0.0.40
codegen_flags: <defaults>
</compile_context>

<pallas_src>
import functools

import jax
import jax.numpy as jnp
import numpy as np
from jax import lax
from jax.experimental import pallas as pl
from jax.experimental.pallas import tpu as pltpu


def _round_up(x, m):
    return ((x + m - 1) // m) * m


def _pick_block_batch(n, q, q_pad):
    # Per-element VMEM for the O(Q^2) temporaries (bytes):
    #   rank stage : (bool + 2 x i32) over (Q, Q)
    #   perm stage : (i32 iota + f32 one-hot) over (q_pad, Q)
    per_elem = q * q * 9 + q_pad * q * 8
    b = max(1, min(8, (8 << 20) // max(per_elem, 1)))   # ~8 MiB budget (v5e-safe)
    if n >= 2:
        b = min(b, n // 2)     # keep >= 2 grid steps so v7x's 2 TCs split the batch
    b = max(b, 1)
    while n % b:               # exact grid: no ragged last block
        b -= 1
    return b


def _postprocess_kernel(tsize_ref, logits_ref, boxes_ref, out_ref, *, q_pad):
    """One grid step processes B batch elements.

    tsize_ref : SMEM (N,)        f32   (scalar-prefetched video sizes)
    logits_ref: VMEM (B, Q, C)   native dtype
    boxes_ref : VMEM (B, 2, Q)   native dtype (row 0 = centers, row 1 = widths)
    out_ref   : VMEM (B, 2, Qp)  int32 (row 0 = sorted class ids,
                                        row 1 = scaled sorted widths)
    """
    logits = logits_ref[...].astype(jnp.float32)           # (B, Q, C)
    B, Q, C = logits.shape

    # ---- argmax over classes directly on logits (softmax is monotone) ----
    lmax = jnp.max(logits, axis=-1, keepdims=True)
    cls_iota = lax.broadcasted_iota(jnp.int32, (B, Q, C), 2)
    preds = jnp.min(jnp.where(logits == lmax, cls_iota, jnp.int32(C)),
                    axis=-1)                                # (B, Q) int32
    preds = jnp.minimum(preds, C - 1)      # NaN guard: never emit an OOB class id

    # ---- centers / widths: lane-dense sublane slices of the (B, 2, Q) block ----
    centers = boxes_ref[:, 0, :].astype(jnp.float32)        # (B, Q)
    widths = boxes_ref[:, 1, :].astype(jnp.float32)         # (B, Q)
    ex = preds == 0
    centers = jnp.where(ex, 0.0, centers)
    widths = jnp.where(ex, 0.0, widths)

    # ---- stable ascending argsort of centers via pairwise ranks ----
    ci = centers[:, :, None]                                # (B, Q, 1)
    cj = centers[:, None, :]                                # (B, 1, Q)
    i_idx = lax.broadcasted_iota(jnp.int32, (B, Q, Q), 1)
    j_idx = lax.broadcasted_iota(jnp.int32, (B, Q, Q), 2)
    before = (cj < ci) | ((cj == ci) & (j_idx < i_idx))
    rank = jnp.sum(before.astype(jnp.int32), axis=2)        # (B, Q), in [0, Q)

    # ---- apply the permutation on the MXU: sorted[b,:,r] = x[b,:,i] with
    # rank[b,i]==r. f32 operands + 0/1 one-hot keep the gathered values exact;
    # padded columns r in [Q, q_pad) match no rank and come out as exactly 0.
    r_iota = lax.broadcasted_iota(jnp.int32, (B, q_pad, Q), 1)
    perm = (rank[:, None, :] == r_iota).astype(jnp.float32)          # (B, Qp, Q)
    stacked = jnp.stack([preds.astype(jnp.float32), widths], axis=1)  # (B, 2, Q)
    sorted2 = jnp.einsum("bxq,brq->bxr", stacked, perm,
                         preferred_element_type=jnp.float32)          # (B, 2, Qp)

    sorted_preds = sorted2[:, 0, :]                          # (B, Qp), exact ints
    sorted_w = sorted2[:, 1, :]                              # (B, Qp)

    # ---- |w| normalized to sum 1 (eps 1e-8); exact reciprocal (1 scalar/row) ----
    abs_w = jnp.abs(sorted_w)
    abs_sum = jnp.sum(abs_w, axis=-1, keepdims=True)         # (B, 1)
    norm_w = abs_w * pl.reciprocal(abs_sum + 1e-8, approx=False)

    # ---- epilogue: write straight into the lane-dense output rows ----
    out_ref[:, 0, :] = sorted_preds.astype(jnp.int32)
    base = pl.program_id(0) * B
    for i in range(B):      # B is small & static; per-row scale by the SMEM scalar
        out_ref[i, 1, :] = (norm_w[i, :] * tsize_ref[base + i]).astype(jnp.int32)


@jax.jit
def post_process(pred_logits, pred_boxes, target_sizes):
    """pred_logits: (N, Q, C); pred_boxes: (N, Q, 2) = (center, width);
    target_sizes: (N,). Returns (sorted class preds (N, Q) int32,
    scaled sorted widths (N, Q) int32)."""
    N, Q, C = pred_logits.shape
    q_pad = max(128, _round_up(Q, 128))       # lane-dense output width
    B = _pick_block_batch(N, Q, q_pad)

    # (N, 2, Q): tiny wrapper transpose so centers/widths land lane-dense.
    boxes_t = jnp.swapaxes(pred_boxes, 1, 2)
    tsize = target_sizes.astype(jnp.float32)  # (N,), scalar-prefetched to SMEM

    kernel = functools.partial(_postprocess_kernel, q_pad=q_pad)

    packed = pl.pallas_call(
        kernel,
        out_shape=jax.ShapeDtypeStruct((N, 2, q_pad), jnp.int32),
        grid_spec=pltpu.PrefetchScalarGridSpec(
            num_scalar_prefetch=1,
            grid=(N // B,),
            in_specs=[
                pl.BlockSpec((B, Q, C), lambda b, ts: (b, 0, 0)),
                pl.BlockSpec((B, 2, Q), lambda b, ts: (b, 0, 0)),
            ],
            out_specs=pl.BlockSpec((B, 2, q_pad), lambda b, ts: (b, 0, 0)),
        ),
        compiler_params=pltpu.CompilerParams(
            dimension_semantics=("parallel",)),
    )(tsize, pred_logits, boxes_t)

    cls_sorted = packed[:, 0, :Q]
    widths_scaled = packed[:, 1, :Q]
    # TODO(synk): torch returns int64 widths; TPU kernel emits int32 (values fit).
    return cls_sorted, widths_scaled


def _reference(pred_logits, pred_boxes, target_sizes):
    """Pure-JAX port of the torch PostProcess.forward for validation."""
    preds = jnp.argmax(jax.nn.softmax(pred_logits, axis=-1), axis=-1)
    boxes = jnp.where((preds == 0)[..., None], 0.0, pred_boxes)
    centers, widths = boxes[..., 0], boxes[..., 1]
    order = jnp.argsort(centers, axis=-1)
    w = jnp.take_along_axis(widths, order, axis=-1)
    cls_sorted = jnp.take_along_axis(preds, order, axis=-1)
    abs_w = jnp.abs(w)
    w = abs_w / (jnp.sum(abs_w, axis=-1, keepdims=True) + 1e-8)
    w = w * target_sizes[:, None]
    return cls_sorted.astype(jnp.int32), w.astype(jnp.int32)


if __name__ == "__main__":
    key = jax.random.PRNGKey(0)
    k_logits, k_boxes = jax.random.split(key, 2)

    N, Q, C = 2, 8, 5  # batch, num queries, num classes
    pred_logits = jax.random.normal(k_logits, (N, Q, C), dtype=jnp.float32)
    # boxes: (center, width) in roughly [0, 1)
    pred_boxes = jax.random.uniform(k_boxes, (N, Q, 2), dtype=jnp.float32)
    target_sizes = jnp.array([100.0, 120.0], dtype=jnp.float32)

    cls_sorted, widths_scaled = post_process(pred_logits, pred_boxes,
                                             target_sizes)
    jax.block_until_ready((cls_sorted, widths_scaled))

    ref_cls, ref_w = _reference(pred_logits, pred_boxes, target_sizes)
    np.testing.assert_array_equal(np.asarray(cls_sorted), np.asarray(ref_cls))
    np.testing.assert_allclose(np.asarray(widths_scaled), np.asarray(ref_w),
                               atol=1)
    print("KERNEL_OK")
</pallas_src>

<mosaic_0001>
module attributes {stable_mosaic.version = 11 : i64} {
  func.func @_postprocess_kernel(%arg0: i32, %arg1: memref<2xf32, #tpu.memory_space<smem>>, %arg2: memref<1x8x5xf32, #tpu.memory_space<vmem>>, %arg3: memref<1x2x8xf32, #tpu.memory_space<vmem>>, %arg4: memref<1x2x128xi32, #tpu.memory_space<vmem>>) attributes {dimension_semantics = [#tpu.dimension_semantics<parallel>], iteration_bounds = array<i64: 2>, scalar_prefetch = 1 : i64, scratch_operands = 0 : i64, tpu.core_type = #tpu.core_type<tc>, window_params = [{transform_indices = @transform_0, window_bounds = array<i64: 1, 8, 5>}, {transform_indices = @transform_1, window_bounds = array<i64: 1, 2, 8>}, {transform_indices = @transform_2, window_bounds = array<i64: 1, 2, 128>}]} {
    %c0 = arith.constant 0 : index
    %c0_0 = arith.constant 0 : index
    %c0_1 = arith.constant 0 : index
    %0 = vector.load %arg2[%c0, %c0_0, %c0_1] : memref<1x8x5xf32, #tpu.memory_space<vmem>>, vector<1x8x5xf32>
    %cst = arith.constant dense<0xFF800000> : vector<1x8xf32>
    %1 = vector.multi_reduction <maximumf>, %0, %cst [2] : vector<1x8x5xf32> to vector<1x8xf32>
    %2 = vector.shape_cast %1 : vector<1x8xf32> to vector<1x8x1xf32>
    %3 = tpu.iota {dimensions = array<i32: 2>} : vector<1x8x5xi32>
    %4 = vector.broadcast %2 : vector<1x8x1xf32> to vector<1x8x5xf32>
    %5 = arith.cmpf oeq, %0, %4 : vector<1x8x5xf32>
    %c5_i32 = arith.constant 5 : i32
    %6 = vector.broadcast %c5_i32 : i32 to vector<1x8x5xi32>
    %7 = arith.select %5, %3, %6 : vector<1x8x5xi1>, vector<1x8x5xi32>
    %cst_2 = arith.constant dense<2147483647> : vector<1x8xi32>
    %8 = vector.multi_reduction <minsi>, %7, %cst_2 [2] : vector<1x8x5xi32> to vector<1x8xi32>
    %c4_i32 = arith.constant 4 : i32
    %9 = vector.broadcast %c4_i32 : i32 to vector<1x8xi32>
    %10 = arith.minsi %8, %9 : vector<1x8xi32>
    %c0_3 = arith.constant 0 : index
    %c0_4 = arith.constant 0 : index
    %c0_5 = arith.constant 0 : index
    %11 = vector.load %arg3[%c0_3, %c0_4, %c0_5] : memref<1x2x8xf32, #tpu.memory_space<vmem>>, vector<1x1x8xf32>
    %12 = vector.shape_cast %11 : vector<1x1x8xf32> to vector<1x8xf32>
    %c0_6 = arith.constant 0 : index
    %c1 = arith.constant 1 : index
    %c0_7 = arith.constant 0 : index
    %13 = vector.load %arg3[%c0_6, %c1, %c0_7] : memref<1x2x8xf32, #tpu.memory_space<vmem>>, vector<1x1x8xf32>
    %14 = vector.shape_cast %13 : vector<1x1x8xf32> to vector<1x8xf32>
    %c0_i32 = arith.constant 0 : i32
    %15 = vector.broadcast %c0_i32 : i32 to vector<1x8xi32>
    %16 = arith.cmpi eq, %10, %15 : vector<1x8xi32>
    %cst_8 = arith.constant 0.000000e+00 : f32
    %17 = vector.broadcast %cst_8 : f32 to vector<1x8xf32>
    %18 = arith.select %16, %17, %12 : vector<1x8xi1>, vector<1x8xf32>
    %cst_9 = arith.constant 0.000000e+00 : f32
    %19 = vector.broadcast %cst_9 : f32 to vector<1x8xf32>
    %20 = arith.select %16, %19, %14 : vector<1x8xi1>, vector<1x8xf32>
    %21 = vector.shape_cast %18 : vector<1x8xf32> to vector<1x8x1xf32>
    %22 = vector.shape_cast %18 : vector<1x8xf32> to vector<1x1x8xf32>
    %23 = tpu.iota {dimensions = array<i32: 1>} : vector<1x8x8xi32>
    %24 = tpu.iota {dimensions = array<i32: 2>} : vector<1x8x8xi32>
    %25 = vector.broadcast %22 : vector<1x1x8xf32> to vector<1x8x8xf32>
    %26 = vector.broadcast %21 : vector<1x8x1xf32> to vector<1x8x8xf32>
    %27 = arith.cmpf olt, %25, %26 : vector<1x8x8xf32>
    %28 = vector.broadcast %22 : vector<1x1x8xf32> to vector<1x8x8xf32>
    %29 = vector.broadcast %21 : vector<1x8x1xf32> to vector<1x8x8xf32>
    %30 = arith.cmpf oeq, %28, %29 : vector<1x8x8xf32>
    %31 = arith.cmpi slt, %24, %23 : vector<1x8x8xi32>
    %32 = arith.andi %30, %31 : vector<1x8x8xi1>
    %33 = arith.ori %27, %32 : vector<1x8x8xi1>
    %34 = arith.extui %33 : vector<1x8x8xi1> to vector<1x8x8xi32>
    %cst_10 = arith.constant dense<0> : vector<1x8xi32>
    %35 = vector.multi_reduction <add>, %34, %cst_10 [2] : vector<1x8x8xi32> to vector<1x8xi32>
    %36 = tpu.iota {dimensions = array<i32: 1>} : vector<1x128x8xi32>
    %37 = vector.shape_cast %35 : vector<1x8xi32> to vector<1x1x8xi32>
    %38 = vector.broadcast %37 : vector<1x1x8xi32> to vector<1x128x8xi32>
    %39 = arith.cmpi eq, %38, %36 : vector<1x128x8xi32>
    %40 = arith.extui %39 : vector<1x128x8xi1> to vector<1x128x8xi32>
    %41 = arith.sitofp %40 : vector<1x128x8xi32> to vector<1x128x8xf32>
    %42 = arith.sitofp %10 : vector<1x8xi32> to vector<1x8xf32>
    %43 = vector.shape_cast %42 : vector<1x8xf32> to vector<1x1x8xf32>
    %44 = vector.shape_cast %20 : vector<1x8xf32> to vector<1x1x8xf32>
    %45 = tpu.concatenate %43, %44 in 1 : vector<1x1x8xf32>, vector<1x1x8xf32> -> vector<1x2x8xf32>
    "tpu.trace_start"() <{level = 10 : i32, message = "bxq,brq->bxr"}> : () -> ()
    %cst_11 = arith.constant dense<0.000000e+00> : vector<1x2x128xf32>
    %46 = tpu.matmul %45, %41, %cst_11 {dimension_numbers = #tpu.dot_dimension_numbers<[2], [2], [1], [1], [0, 0, 0, 1, 1, 1], [0], [0]>} : vector<1x2x8xf32>, vector<1x128x8xf32>, vector<1x2x128xf32> -> vector<1x2x128xf32>
    "tpu.trace_stop"() : () -> ()
    %47 = vector.extract_strided_slice %46 {offsets = [0, 0, 0], sizes = [1, 1, 128], strides = [1, 1, 1]} : vector<1x2x128xf32> to vector<1x1x128xf32>
    %48 = vector.shape_cast %47 : vector<1x1x128xf32> to vector<1x128xf32>
    %49 = vector.extract_strided_slice %46 {offsets = [0, 1, 0], sizes = [1, 1, 128], strides = [1, 1, 1]} : vector<1x2x128xf32> to vector<1x1x128xf32>
    %50 = vector.shape_cast %49 : vector<1x1x128xf32> to vector<1x128xf32>
    %51 = math.absf %50 : vector<1x128xf32>
    %cst_12 = arith.constant dense<0.000000e+00> : vector<1xf32>
    %52 = vector.multi_reduction <add>, %51, %cst_12 [1] : vector<1x128xf32> to vector<1xf32>
    %53 = vector.shape_cast %52 : vector<1xf32> to vector<1x1xf32>
    %cst_13 = arith.constant 9.99999993E-9 : f32
    %54 = vector.broadcast %cst_13 : f32 to vector<1x1xf32>
    %55 = arith.addf %53, %54 : vector<1x1xf32>
    %56 = tpu.reciprocal %55 : vector<1x1xf32> -> vector<1x1xf32>
    %57 = vector.broadcast %56 : vector<1x1xf32> to vector<1x128xf32>
    %58 = arith.mulf %51, %57 : vector<1x128xf32>
    %59 = arith.fptosi %48 : vector<1x128xf32> to vector<1x128xi32>
    %c0_14 = arith.constant 0 : index
    %c0_15 = arith.constant 0 : index
    %c0_16 = arith.constant 0 : index
    %60 = vector.load %arg4[%c0_14, %c0_15, %c0_16] : memref<1x2x128xi32, #tpu.memory_space<vmem>>, vector<1x1x128xi32>
    %61 = vector.shape_cast %60 : vector<1x1x128xi32> to vector<1x128xi32>
    %62 = vector.shape_cast %59 : vector<1x128xi32> to vector<1x1x128xi32>
    tpu.vector_store %arg4[%c0_14, %c0_15, %c0_16], %62 {strides = array<i32>} : memref<1x2x128xi32, #tpu.memory_space<vmem>>, vector<1x1x128xi32>,
    %c1_i32 = arith.constant 1 : i32
    %63 = arith.muli %arg0, %c1_i32 : i32
    %64 = vector.shape_cast %58 : vector<1x128xf32> to vector<128xf32>
    %c0_i32_17 = arith.constant 0 : i32
    %65 = arith.addi %63, %c0_i32_17 : i32
    %66 = arith.index_cast %65 : i32 to index
    %67 = memref.load %arg1[%66] : memref<2xf32, #tpu.memory_space<smem>>
    %68 = vector.broadcast %67 : f32 to vector<128xf32>
    %69 = arith.mulf %64, %68 : vector<128xf32>
    %70 = arith.fptosi %69 : vector<128xf32> to vector<128xi32>
    %c0_18 = arith.constant 0 : index
    %c1_19 = arith.constant 1 : index
    %c0_20 = arith.constant 0 : index
    %71 = vector.load %arg4[%c0_18, %c1_19, %c0_20] : memref<1x2x128xi32, #tpu.memory_space<vmem>>, vector<1x1x128xi32>
    %72 = vector.shape_cast %71 : vector<1x1x128xi32> to vector<128xi32>
    %73 = vector.shape_cast %70 : vector<128xi32> to vector<1x1x128xi32>
    tpu.vector_store %arg4[%c0_18, %c1_19, %c0_20], %73 {strides = array<i32>} : memref<1x2x128xi32, #tpu.memory_space<vmem>>, vector<1x1x128xi32>,
    return
  }
  func.func @transform_0(%arg0: i32, %arg1: memref<2xf32, #tpu.memory_space<smem>>) -> (i32, i32, i32) {
    %c0_i32 = arith.constant 0 : i32
    %c0_i32_0 = arith.constant 0 : i32
    %c0_i32_1 = arith.constant 0 : i32
    return %arg0, %c0_i32, %c0_i32_0 : i32, i32, i32
  }
  func.func @transform_1(%arg0: i32, %arg1: memref<2xf32, #tpu.memory_space<smem>>) -> (i32, i32, i32) {
    %c0_i32 = arith.constant 0 : i32
    %c0_i32_0 = arith.constant 0 : i32
    %c0_i32_1 = arith.constant 0 : i32
    return %arg0, %c0_i32, %c0_i32_0 : i32, i32, i32
  }
  func.func @transform_2(%arg0: i32, %arg1: memref<2xf32, #tpu.memory_space<smem>>) -> (i32, i32, i32) {
    %c0_i32 = arith.constant 0 : i32
    %c0_i32_0 = arith.constant 0 : i32
    %c0_i32_1 = arith.constant 0 : i32
    return %arg0, %c0_i32, %c0_i32_0 : i32, i32, i32
  }
}

</mosaic_0001>

<bundles_post_ra>
// kernel: post_process.1
= control target key start
LH: loop header
LB: loop body
LE: loop exit
PB: predicated region body
PF: predicated region fallthrough
CT: control target
= control target key end

     0   :  { %s4321_s0 = inlined_call_operand.vmem [shape: f32[2], index: 0, kind: input, shape index: {}]   ;;  %s4322_s1 = inlined_call_operand.vmem [shape: f32[2,8,5], index: 1, kind: input, shape index: {}]   ;;  %s4323_s2 = inlined_call_operand.vmem [shape: f32[2,2,8], index: 2, kind: input, shape index: {}]   ;;  %s4324_s3 = inlined_call_operand.vmem [shape: s32[2,2,128], index: 3, kind: output, shape index: {}]  }
   0x1   :  { %s8_s14 = sshll.u32 %s4321_s0, 4  ;;  %s9_s14 = int_to_ptr.vmem [resolvable:$true] %s8_s14 }
   0x2   :  { %s3279_s15 = scalar_lea.vmem %s9_s14, 16  ;;  %p3284_p1 = scmp.lt.s32.totalorder %s9_s14, %s9_s14 }
   0x3   :  { %p3280_p0 = scmp.ne.s32.totalorder %s9_s14, %s3279_s15  ;;  %p3285_p2 = scmp.lt.s32.totalorder %s3279_s15, %s3279_s15 }
   0x5   :  { %p3286_p3 = por %p3285_p2, %p3284_p1 }
   0x7   :  { %p3287_p4 = pnand %p3286_p3, %p3280_p0 }
   0x9   :  { %3290 = shalt.err (!%p3287_p4)  }
   0xa   :  { %s3301_s16 = smov [#allocation3]  }
   0xb   :  { %11 = dma.vmem_to_smem %s9_s14, 16, %s3301_s16, [#allocation2] }
   0xc   :  { %3295 = dma.done.wait [#allocation2], 16 }
   0xd   :  { %3296 = vsyncadd [#allocation2], 4294967280 }
   0xe   :  { %13 = sfence }
   0xf   :  { %s3329_s17 = smov 0  }
  0x10 LB: > { %s3335_s0 = sadd.s32 4294967295, %s3299_s17   ;;  %p2701_p5 = scmp.ge.s32.totalorder %s3299_s17, 1  ;;  %s3299_s17 = sphi %s3329_s17, %s19_s17  }
  0x11   : > { %p127_p6 = scmp.lt.s32.totalorder %s3299_s17, 3 }
  0x13   : > { %p128_p7 = pnand %p2701_p5, %p127_p6 }
  0x14   : > { %p151_p8 = scmp.lt.s32.totalorder (!%p128_p7), %s3335_s0, 1  ;;  %v3302_v0 = vmov (!%p128_p7), 0   ;;  %vm164_vm0 = vcmask (!%p128_p7), 39936   ;;  %v168_v3 = vlaneseq (!%p128_p7)  ;;  %s2627_s30 = sld [smem:[#allocation3 + %s3335_s0]] (!%p128_p7) }
  0x15   : > { %131 = sbr.rel (%p128_p7) target bundleno = 1590 (0x636), region = 28  ;;  %2955 = vset.pattern.permute.xlu0 (!%p128_p7), %v3302_v0  ;;  %2956 = vset.pattern.permute.xlu1 (!%p128_p7), %v3302_v0 }
  0x16   : > { %v3349_v4 = vand.u32 (!%p128_p7), 127, %v168_v3  ;;  %v3352_v14 = vshrl.u32 (!%p128_p7), %v168_v3, 7 }
  0x18   : > { %vm274_vm3 = vcmp.lt.s32.totalorder (!%p128_p7), %v3349_v4, %v3352_v14  ;;  %v3365_v15 = vsub.s32 (!%p128_p7), 0, %v3352_v14  ;;  %v3371_v19 = vsub.s32 (!%p128_p7), 1, %v3352_v14  ;;  %v3375_v21 = vsub.s32 (!%p128_p7), 2, %v3352_v14 }
  0x19   : > { %v275_v16 = vsel (!%p128_p7), %vm274_vm3, 1, %v3302_v0  ;;  %v3379_v23 = vsub.s32 (!%p128_p7), 3, %v3352_v14  ;;  %v3383_v25 = vsub.s32 (!%p128_p7), 4, %v3352_v14  ;;  %v3387_v27 = vsub.s32 (!%p128_p7), 5, %v3352_v14 }
  0x1a   : > { %v279_v18 = vrot.slane (!%p128_p7), %v275_v16, %v3365_v15  ;;  %v286_v20 = vrot.slane (!%p128_p7), %v275_v16, %v3371_v19  ;;  %v293_v22 = vrot.slane (!%p128_p7), %v275_v16, %v3375_v21  ;;  %v3391_v29 = vsub.s32 (!%p128_p7), 6, %v3352_v14 }
  0x1b   : > { %v300_v24 = vrot.slane (!%p128_p7), %v275_v16, %v3379_v23  ;;  %v307_v26 = vrot.slane (!%p128_p7), %v275_v16, %v3383_v25  ;;  %v314_v28 = vrot.slane (!%p128_p7), %v275_v16, %v3387_v27  ;;  %v3395_v31 = vsub.s32 (!%p128_p7), 7, %v3352_v14 }
  0x1c   : > { %s3343_s18 = scalar_select %p151_p8, %s3335_s0, 1  ;;  %v321_v30 = vrot.slane %v275_v16, %v3391_v29 }
  0x1d   : > { %v328_v32 = vrot.slane %v275_v16, %v3395_v31 }
  0x1e   : > { %s2702_s19 = sshll.u32 %s3343_s18, 3  ;;  %s2703_s23 = sshll.u32 %s3343_s18, 1 }
  0x1f   : > { %s154_s22 = scalar_lea.vmem %s4322_s1, %s2702_s19  ;;  %s3362_s26 = scalar_lea.vmem %s4323_s2, %s2703_s23 }
  0x20   : > { %v163_v1 = vld [vmem:[%s154_s22] sm:$0xff]  ;;  %s162_s29 = scalar_lea.vmem %s4324_s3, %s2703_s23 }
  0x21   : > { %v165_v2 = vsel %vm164_vm0, %v163_v1, -inf  ;;  %v2705_v17 = vld [vmem:[%s3362_s26] ss:$0 sm:$0xff] }
  0x22   : > { %166 = vmax.xlane.f32.xlu0 %v165_v2 }
  0xaf   : > { %v167_v5 = vpop.xlane.xlu0 %166 }
  0xb0   : > { %vm170_vm1 = vcmp.eq.f32.partialorder %v163_v1, %v167_v5 }
  0xb1   : > { %v171_v6 = vsel %vm170_vm1, %v3349_v4, 5 }
  0xb2   : > { %v172_v7 = vsel %vm164_vm0, %v171_v6, 2147483647  ;;  %v2706_v6 = vld [vmem:[%s3362_s26 + $0x1] ss:$0 sm:$0xff] }
  0xb3   : > { %v174_v8 = vshra.s32 %v172_v7, 16  ;;  %v173_v10 = vand.u32 65535, %v172_v7  ;;  %v3454_v7 = vsub.s32 %v3349_v4, %v3352_v14 }
  0xb5   : > { %v176_v9 = vcvt.s32.f32 %v174_v8  ;;  %v175_v12 = vcvt.s32.f32 %v173_v10 }
  0xb7   : > { %177 = vmin.xlane.f32.xlu0 %v176_v9 }
 0x144   : > { %v178_v11 = vpop.xlane.xlu0 %177 }
 0x145   : > { %vm179_vm2 = vcmp.eq.f32.partialorder %v176_v9, %v178_v11  ;;  %v184_v33 = vcvt.f32.s32 %v178_v11 }
 0x146   : > { %v180_v13 = vsel %vm179_vm2, %v175_v12, inf }
 0x147   : > { %181 = vmin.xlane.f32.xlu1 %v180_v13  ;;  %v185_v35 = vshll.u32 %v184_v33, 16 }
 0x158   : > { %198 = vbcast.lane.b32.xlu1 %v2705_v17, 256 }
 0x15c   : > { %281 = vbcast.lane.b32.xlu1 %v279_v18, 256 }
 0x160   : > { %288 = vbcast.lane.b32.xlu1 %v286_v20, 256 }
 0x164   : > { %295 = vbcast.lane.b32.xlu1 %v293_v22, 256 }
 0x168   : > { %302 = vbcast.lane.b32.xlu1 %v300_v24, 256 }
 0x16c   : > { %309 = vbcast.lane.b32.xlu1 %v307_v26, 256 }
 0x170   : > { %316 = vbcast.lane.b32.xlu1 %v314_v28, 256 }
 0x174   : > { %323 = vbcast.lane.b32.xlu1 %v321_v30, 256 }
 0x178   : > { %330 = vbcast.lane.b32.xlu1 %v328_v32, 256 }
 0x1d4   : > { %v182_v34 = vpop.xlane.xlu1 %181 }
 0x1d5   : > { %v183_v36 = vcvt.f32.s32 %v182_v34 }
 0x1d7   : > { %v186_v37 = vadd.s32 %v185_v35, %v183_v36 }
 0x1d8   : > { %v199_v38 = vpop.permute.xlu1 %198 }
 0x1d9   : > { %vm187_vm4 = vcmp.lt.s32.totalorder %v186_v37, 4 }
 0x1da   : > { %v3398_v39 = vsel %vm187_vm4, %v186_v37, 4 }
 0x1db   : > { %vm4325_vm5 = vcmp.eq.s32.totalorder %v3398_v39, 0 }
 0x1dc   : > { %v3403_v40 = vsel %vm4325_vm5, 0.0, %v199_v38  ;;  %v282_v41 = vpop.permute.xlu1 %281 }
 0x1dd   : > { %216 = vperm.xlu0 %2955, %v3403_v40   ;;  %vm332_vm10 = vcmp.ne.s32.totalorder %v282_v41, 0 }
 0x1e0   : > { %v289_v42 = vpop.permute.xlu1 %288 }
 0x1e1   : > { %vm333_vm15 = vcmp.ne.s32.totalorder %v289_v42, 0 }
 0x1e4   : > { %v296_v43 = vpop.permute.xlu1 %295 }
 0x1e8   : > { %v303_v44 = vpop.permute.xlu1 %302 }
 0x1ec   : > { %v310_v45 = vpop.permute.xlu1 %309 }
 0x1f0   : > { %v317_v46 = vpop.permute.xlu1 %316 }
 0x1f4   : > { %v324_v47 = vpop.permute.xlu1 %323 }
 0x1f8   : > { %v331_v48 = vpop.permute.xlu1 %330 }
 0x1f9   : > { %vm339_vm6 = vcmp.ne.s32.totalorder %v331_v48, 0 }
 0x25c   : > { %v217_v49 = vpop.permute.xlu0 %216 }
 0x25d   : > { %v249_v50 = vrot.slane %v217_v49, %v3395_v31  ;;  %v221_v51 = vrot.slane %v217_v49, %v3365_v15  ;;  %v225_v52 = vrot.slane %v217_v49, %v3371_v19  ;;  %v229_v53 = vrot.slane %v217_v49, %v3375_v21 }
 0x25e   : > { %v233_v55 = vrot.slane %v217_v49, %v3379_v23  ;;  %v237_v56 = vrot.slane %v217_v49, %v3383_v25  ;;  %v241_v58 = vrot.slane %v217_v49, %v3387_v27  ;;  %v245_v61 = vrot.slane %v217_v49, %v3391_v29 }
 0x25f   : > { %vm273_vm7 = vcmp.eq.f32.partialorder %v3403_v40, %v249_v50  ;;  %vm266_vm8 = vcmp.eq.f32.partialorder %v3403_v40, %v221_v51  ;;  %vm258_vm9 = vcmp.lt.f32.partialorder %v3403_v40, %v221_v51  ;;  %vm267_vm12 = vcmp.eq.f32.partialorder %v3403_v40, %v225_v52 }
 0x260   : > { %vm3413_vm11 = vmand %vm273_vm7, %vm339_vm6  ;;  %vm259_vm14 = vcmp.lt.f32.partialorder %v3403_v40, %v225_v52  ;;  %vm268_vm1 = vcmp.eq.f32.partialorder %v3403_v40, %v229_v53  ;;  %vm265_vm2 = vcmp.lt.f32.partialorder %v3403_v40, %v249_v50  ;;  %vm260_vm4 = vcmp.lt.f32.partialorder %v3403_v40, %v229_v53 }
 0x261   : > { %vm340_vm13 = vmand %vm266_vm8, %vm332_vm10  ;;  %vm334_vm6 = vcmp.ne.s32.totalorder %v296_v43, 0  ;;  %vm335_vm7 = vcmp.ne.s32.totalorder %v303_v44, 0  ;;  %vm269_vm8 = vcmp.eq.f32.partialorder %v3403_v40, %v233_v55  ;;  %vm261_vm10 = vcmp.lt.f32.partialorder %v3403_v40, %v233_v55 }
 0x262   : > { %vm348_vm0 = vmor %vm258_vm9, %vm340_vm13  ;;  %vm336_vm13 = vcmp.ne.s32.totalorder %v310_v45, 0  ;;  %v3480_v51 = vadd.s32 8, %v3352_v14  ;;  %v482_v55 = vrot.slane %v3352_v14, %v3383_v25 }
 0x263   : > { %v356_v57 = vsel %vm348_vm0, 1, %v3302_v0  ;;  %vm341_vm3 = vmand %vm267_vm12, %vm333_vm15  ;;  %vm262_vm15 = vcmp.lt.f32.partialorder %v3403_v40, %v237_v56 }
 0x264   : > { %365 = vperm.xlu0 %2955, %v356_v57   ;;  %vm349_vm5 = vmor %vm259_vm14, %vm341_vm3  ;;  %vm270_vm14 = vcmp.eq.f32.partialorder %v3403_v40, %v237_v56  ;;  %v466_v56 = vrot.slane %v3352_v14, %v3365_v15  ;;  %v470_v57 = vrot.slane %v3352_v14, %v3371_v19 }
 0x265   : > { %v357_v59 = vsel %vm349_vm5, 1, %v3302_v0  ;;  %vm342_vm9 = vmand %vm268_vm1, %vm334_vm6  ;;  %vm337_vm1 = vcmp.ne.s32.totalorder %v317_v46, 0  ;;  %vm338_vm6 = vcmp.ne.s32.totalorder %v324_v47, 0  ;;  %v1359_v46 = vcvt.s32.f32 %v3398_v39 }
 0x266   : > { %vm3431_vm0 = vmor %vm265_vm2, %vm3413_vm11  ;;  %368 = vperm.xlu1 %2956, %v357_v59   ;;  %vm271_vm11 = vcmp.eq.f32.partialorder %v3403_v40, %v241_v58  ;;  %v3493_v59 = vadd.s32 16, %v3352_v14 }
 0x267   : > { %vm350_vm12 = vmor %vm260_vm4, %vm342_vm9  ;;  %vm263_vm4 = vcmp.lt.f32.partialorder %v3403_v40, %v241_v58  ;;  %v363_v5 = vsel %vm3431_vm0, 1, %v3302_v0  ;;  %vm424_vm0 = vcmask 1043459   ;;  %v1364_v48 = vrot.slane %v1359_v46, %v3454_v7 }
 0x268   : > { %v358_v62 = vsel %vm350_vm12, 1, %v3302_v0  ;;  %vm343_vm5 = vmand %vm269_vm8, %vm335_vm7  ;;  %vm272_vm12 = vcmp.eq.f32.partialorder %v3403_v40, %v245_v61  ;;  %vm264_vm8 = vcmp.lt.f32.partialorder %v3403_v40, %v245_v61  ;;  %v498_v58 = vrot.slane %v3480_v51, %v3365_v15 }
 0x269   : > { %371 = vperm.xlu0 %2955, %v358_v62   ;;  %vm351_vm3 = vmor %vm261_vm10, %vm343_vm5  ;;  %v502_v62 = vrot.slane %v3480_v51, %v3371_v19 }
 0x26a   : > { %v359_v63 = vsel %vm351_vm3, 1, %v3302_v0  ;;  %vm344_vm2 = vmand %vm270_vm14, %vm336_vm13  ;;  %vm420_vm14 = vcmask 1041409   ;;  %vm428_vm3 = vcmask 1045509  }
 0x26b   : > { %374 = vperm.xlu1 %2956, %v359_v63   ;;  %vm352_vm9 = vmor %vm262_vm15, %vm344_vm2  ;;  %vm422_vm15 = vcmask 1042434   ;;  %vm432_vm2 = vcmask 1047559   ;;  %v474_v63 = vrot.slane %v3352_v14, %v3375_v21 }
 0x26c   : > { %v360_v1 = vsel %vm352_vm9, 1, %v3302_v0  ;;  %vm345_vm7 = vmand %vm271_vm11, %vm337_vm1  ;;  %vm426_vm1 = vcmask 1044484   ;;  %vm430_vm11 = vcmask 1046534   ;;  %vm1375_vm9 = vcmask 1040384  }
 0x26d   : > { %377 = vperm.xlu0 %2955, %v360_v1   ;;  %vm353_vm10 = vmor %vm263_vm4, %vm345_vm7  ;;  %vm434_vm4 = vcmask 64512   ;;  %v478_v1 = vrot.slane %v3352_v14, %v3379_v23 }
 0x26e   : > { %v361_v2 = vsel %vm353_vm10, 1, %v3302_v0  ;;  %vm346_vm5 = vmand %vm272_vm12, %vm338_vm6  ;;  %vm4330_vm6 = vcmp.eq.s32.totalorder %v3398_v39, 0  ;;  %v486_v39 = vrot.slane %v3352_v14, %v3387_v27 }
 0x26f   : > { %380 = vperm.xlu1 %2956, %v361_v2   ;;  %vm354_vm13 = vmor %vm264_vm8, %vm346_vm5  ;;  %v514_v2 = vrot.slane %v3480_v51, %v3383_v25 }
 0x270   : > { %v362_v3 = vsel %vm354_vm13, 1, %v3302_v0 }
 0x271   : > { %383 = vperm.xlu0 %2955, %v362_v3   ;;  %v518_v3 = vrot.slane %v3480_v51, %v3387_v27 }
 0x273   : > { %386 = vperm.xlu1 %2956, %v363_v5   ;;  %v3506_v5 = vadd.s32 24, %v3352_v14 }
 0x275   : > { %208 = vbcast.lane.b32.xlu0 %v2706_v6, 256 }
 0x2e3   : > { %v366_v8 = vpop.permute.xlu0 %365 }
 0x2e4   : > { %v391_v9 = vrot.slane %v366_v8, %v3454_v7  ;;  %v490_v8 = vrot.slane %v3352_v14, %v3391_v29 }
 0x2e5   : > { %v369_v10 = vpop.permute.xlu1 %368 }
 0x2e6   : > { %v395_v11 = vrot.slane %v369_v10, %v3454_v7  ;;  %v506_v10 = vrot.slane %v3480_v51, %v3375_v21 }
 0x2e8   : > { %v372_v12 = vpop.permute.xlu0 %371  ;;  %v421_v0 = vsel %vm420_vm14, %v395_v11, %v391_v9  ;;  %v494_v9 = vrot.slane %v3352_v14, %v3395_v31  ;;  %v530_v11 = vrot.slane %v3493_v59, %v3365_v15 }
 0x2e9   : > { %v399_v13 = vrot.slane %v372_v12, %v3454_v7  ;;  %v534_v12 = vrot.slane %v3493_v59, %v3371_v19 }
 0x2ea   : > { %v375_v16 = vpop.permute.xlu1 %374 }
 0x2eb   : > { %v423_v17 = vsel %vm422_vm15, %v399_v13, %v421_v0  ;;  %v403_v4 = vrot.slane %v375_v16, %v3454_v7  ;;  %v510_v13 = vrot.slane %v3480_v51, %v3379_v23  ;;  %v546_v0 = vrot.slane %v3493_v59, %v3383_v25 }
 0x2ec   : > { %v378_v18 = vpop.permute.xlu0 %377  ;;  %v3303_v16 = vmov 0.0  }
 0x2ed   : > { %v407_v20 = vrot.slane %v378_v18, %v3454_v7  ;;  %v425_v22 = vsel %vm424_vm0, %v403_v4, %v423_v17 }
 0x2ee   : > { %v381_v24 = vpop.permute.xlu1 %380 }
 0x2ef   : > { %v427_v26 = vsel %vm426_vm1, %v407_v20, %v425_v22  ;;  %v411_v28 = vrot.slane %v381_v24, %v3454_v7 }
 0x2f0   : > { %v384_v30 = vpop.permute.xlu0 %383 }
 0x2f1   : > { %v415_v32 = vrot.slane %v384_v30, %v3454_v7  ;;  %v429_v33 = vsel %vm428_vm3, %v411_v28, %v427_v26 }
 0x2f2   : > { %v387_v34 = vpop.permute.xlu1 %386 }
 0x2f3   : > { %v431_v35 = vsel %vm430_vm11, %v415_v32, %v429_v33  ;;  %v419_v36 = vrot.slane %v387_v34, %v3454_v7  ;;  %v550_v33 = vrot.slane %v3493_v59, %v3387_v27 }
 0x2f4   : > { %v209_v37 = vpop.permute.xlu0 %208 }
 0x2f5   : > { %v211_v38 = vsel %vm4330_vm6, 0.0, %v209_v37  ;;  %v433_v40 = vsel %vm432_vm2, %v419_v36, %v431_v35  ;;  %v522_v35 = vrot.slane %v3480_v51, %v3391_v29 }
 0x2f6   : > { %1368 = vperm.xlu0 %2955, %v211_v38   ;;  %v435_v41 = vsel %vm434_vm4, %v433_v40, 0 }
 0x2f7   : > { %v436_v42 = vand.u32 65535, %v435_v41  ;;  %v437_v44 = vshrl.u32 %v435_v41, 16 }
 0x2f9   : > { %v438_v43 = vcvt.s32.f32 %v436_v42  ;;  %v439_v45 = vcvt.s32.f32 %v437_v44  ;;  %v526_v42 = vrot.slane %v3480_v51, %v3395_v31  ;;  %v570_v44 = vrot.slane %v3506_v5, %v3375_v21 }
 0x2fa   : > { %v542_v51 = vrot.slane %v3493_v59, %v3379_v23 }
 0x2fb   : > { %440 = vadd.xlane.f32.xlu1 %v438_v43  ;;  %v566_v43 = vrot.slane %v3506_v5, %v3371_v19 }
 0x315   : > { %442 = vadd.xlane.f32.xlu0 %v439_v45  ;;  %v538_v45 = vrot.slane %v3493_v59, %v3375_v21 }
 0x375   : > { %v1369_v47 = vpop.permute.xlu0 %1368 }
 0x376   : > { %v1373_v49 = vrot.slane %v1369_v47, %v3454_v7 }
 0x378   : > { %v3477_v50 = vsel %vm1375_vm9, %v1364_v48, %v1373_v49 }
 0x388   : > { %v441_v52 = vpop.xlane.xlu1 %440 }
 0x389   : > { %v444_v60 = vcvt.f32.s32 %v441_v52 }
 0x3a2   : > { %v443_v53 = vpop.xlane.xlu0 %442 }
 0x3a3   : > { %v445_v54 = vcvt.f32.s32 %v443_v53 }
 0x3a5   : > { %v446_v61 = vshll.u32 %v445_v54, 16  ;;  %v582_v54 = vrot.slane %v3506_v5, %v3387_v27 }
 0x3a7   : > { %v3508_v6 = vadd.s32 %v446_v61, %v444_v60 }
 0x3a9   : > { %vm979_vm12 = vcmp.eq.s32.totalorder %v3508_v6, %v482_v55  ;;  %vm980_vm7 = vcmp.eq.s32.totalorder %v3508_v6, %v486_v39  ;;  %vm975_vm8 = vcmp.eq.s32.totalorder %v3508_v6, %v466_v56  ;;  %vm976_vm10 = vcmp.eq.s32.totalorder %v3508_v6, %v470_v57 }
 0x3aa   : > { %v2711_v17 = vsel %vm979_vm12, 1.0, %v3303_v16  ;;  %v2712_v4 = vsel %vm980_vm7, 1.0, %v3303_v16  ;;  %v2707_v18 = vsel %vm975_vm8, 1.0, %v3303_v16  ;;  %v2708_v20 = vsel %vm976_vm10, 1.0, %v3303_v16 }
 0x3ab   : > { %v2967_v22 = vpack.i.bf16 %v2712_v4, %v2711_v17  ;;  %v2957_v24 = vpack.i.bf16 %v2708_v20, %v2707_v18  ;;  %vm983_vm5 = vcmp.eq.s32.totalorder %v3508_v6, %v498_v58  ;;  %vm984_vm13 = vcmp.eq.s32.totalorder %v3508_v6, %v502_v62 }
 0x3ac   : > { %v2715_v26 = vsel %vm983_vm5, 1.0, %v3303_v16  ;;  %v2716_v28 = vsel %vm984_vm13, 1.0, %v3303_v16  ;;  %vm977_vm6 = vcmp.eq.s32.totalorder %v3508_v6, %v474_v63  ;;  %vm978_vm9 = vcmp.eq.s32.totalorder %v3508_v6, %v478_v1 }
 0x3ad   : > { %2968 = vperm.xlu0 %2955, %v2967_v22   ;;  %2958 = vperm.xlu1 %2956, %v2957_v24   ;;  %v2709_v30 = vsel %vm977_vm6, 1.0, %v3303_v16  ;;  %v2710_v32 = vsel %vm978_vm9, 1.0, %v3303_v16  ;;  %vm987_vm12 = vcmp.eq.s32.totalorder %v3508_v6, %v514_v2  ;;  %v2977_v34 = vpack.i.bf16 %v2716_v28, %v2715_v26 }
 0x3ae   : > { %vm988_vm7 = vcmp.eq.s32.totalorder %v3508_v6, %v518_v3  ;;  %vm981_vm8 = vcmp.eq.s32.totalorder %v3508_v6, %v490_v8  ;;  %v2962_v36 = vpack.i.bf16 %v2710_v32, %v2709_v30  ;;  %v2719_v37 = vsel %vm987_vm12, 1.0, %v3303_v16 }
 0x3af   : > { %v2720_v38 = vsel %vm988_vm7, 1.0, %v3303_v16  ;;  %vm982_vm10 = vcmp.eq.s32.totalorder %v3508_v6, %v494_v9  ;;  %v2713_v40 = vsel %vm981_vm8, 1.0, %v3303_v16  ;;  %vm991_vm5 = vcmp.eq.s32.totalorder %v3508_v6, %v530_v11 }
 0x3b0   : > { %v2714_v41 = vsel %vm982_vm10, 1.0, %v3303_v16  ;;  %vm992_vm13 = vcmp.eq.s32.totalorder %v3508_v6, %v534_v12  ;;  %vm985_vm6 = vcmp.eq.s32.totalorder %v3508_v6, %v506_v10  ;;  %vm986_vm9 = vcmp.eq.s32.totalorder %v3508_v6, %v510_v13 }
 0x3b1   : > { %2978 = vperm.xlu0 %2955, %v2977_v34   ;;  %2963 = vperm.xlu1 %2956, %v2962_v36   ;;  %v2987_v46 = vpack.i.bf16 %v2720_v38, %v2719_v37  ;;  %v2972_v47 = vpack.i.bf16 %v2714_v41, %v2713_v40  ;;  %v2723_v48 = vsel %vm991_vm5, 1.0, %v3303_v16  ;;  %v2724_v49 = vsel %vm992_vm13, 1.0, %v3303_v16 }
 0x3b2   : > { %v2717_v52 = vsel %vm985_vm6, 1.0, %v3303_v16  ;;  %v2718_v53 = vsel %vm986_vm9, 1.0, %v3303_v16  ;;  %vm995_vm12 = vcmp.eq.s32.totalorder %v3508_v6, %v546_v0  ;;  %vm996_vm7 = vcmp.eq.s32.totalorder %v3508_v6, %v550_v33 }
 0x3b3   : > { %vm989_vm8 = vcmp.eq.s32.totalorder %v3508_v6, %v522_v35  ;;  %vm990_vm10 = vcmp.eq.s32.totalorder %v3508_v6, %v526_v42  ;;  %v586_v55 = vrot.slane %v3506_v5, %v3391_v29  ;;  %v554_v39 = vrot.slane %v3493_v59, %v3391_v29 }
 0x3b4   : > { %v3581_v56 = vadd.s32 32, %v3352_v14  ;;  %v2997_v57 = vpack.i.bf16 %v2724_v49, %v2723_v48  ;;  %v2982_v58 = vpack.i.bf16 %v2718_v53, %v2717_v52  ;;  %v2727_v60 = vsel %vm995_vm12, 1.0, %v3303_v16 }
 0x3b5   : > { %2988 = vperm.xlu0 %2955, %v2987_v46   ;;  %2973 = vperm.xlu1 %2956, %v2972_v47   ;;  %v2728_v61 = vsel %vm996_vm7, 1.0, %v3303_v16  ;;  %v2721_v62 = vsel %vm989_vm8, 1.0, %v3303_v16  ;;  %v2722_v63 = vsel %vm990_vm10, 1.0, %v3303_v16  ;;  %vm1000_vm5 = vcmp.eq.s32.totalorder %v3508_v6, %v566_v43 }
 0x3b6   : > { %vm1001_vm13 = vcmp.eq.s32.totalorder %v3508_v6, %v570_v44  ;;  %vm993_vm6 = vcmp.eq.s32.totalorder %v3508_v6, %v538_v45  ;;  %vm994_vm9 = vcmp.eq.s32.totalorder %v3508_v6, %v542_v51  ;;  %v562_v1 = vrot.slane %v3506_v5, %v3365_v15 }
 0x3b7   : > { %v594_v2 = vrot.slane %v3581_v56, %v3365_v15  ;;  %v598_v3 = vrot.slane %v3581_v56, %v3371_v19  ;;  %v574_v8 = vrot.slane %v3506_v5, %v3379_v23  ;;  %v3600_v9 = vadd.s32 40, %v3352_v14 }
 0x3b8   : > { %v3007_v10 = vpack.i.bf16 %v2728_v61, %v2727_v60  ;;  %v2992_v11 = vpack.i.bf16 %v2722_v63, %v2721_v62  ;;  %v2732_v12 = vsel %vm1000_vm5, 1.0, %v3303_v16  ;;  %v2733_v13 = vsel %vm1001_vm13, 1.0, %v3303_v16 }
 0x3b9   : > { %2998 = vperm.xlu0 %2955, %v2997_v57   ;;  %2983 = vperm.xlu1 %2956, %v2982_v58   ;;  %v2725_v0 = vsel %vm993_vm6, 1.0, %v3303_v16  ;;  %v2726_v17 = vsel %vm994_vm9, 1.0, %v3303_v16  ;;  %vm1004_vm12 = vcmp.eq.s32.totalorder %v3508_v6, %v582_v54  ;;  %vm1005_vm7 = vcmp.eq.s32.totalorder %v3508_v6, %v586_v55 }
 0x3ba   : > { %vm997_vm8 = vcmp.eq.s32.totalorder %v3508_v6, %v554_v39  ;;  %vm999_vm10 = vcmp.eq.s32.totalorder %v3508_v6, %v562_v1  ;;  %v578_v4 = vrot.slane %v3506_v5, %v3383_v25  ;;  %v602_v18 = vrot.slane %v3581_v56, %v3375_v21 }
 0x3bb   : > { %v634_v20 = vrot.slane %v3600_v9, %v3375_v21  ;;  %v558_v22 = vrot.slane %v3493_v59, %v3395_v31  ;;  %v3017_v24 = vpack.i.bf16 %v2733_v13, %v2732_v12  ;;  %v3002_v26 = vpack.i.bf16 %v2726_v17, %v2725_v0 }
 0x3bc   : > { %v2736_v28 = vsel %vm1004_vm12, 1.0, %v3303_v16  ;;  %v2737_v30 = vsel %vm1005_vm7, 1.0, %v3303_v16  ;;  %v2729_v32 = vsel %vm997_vm8, 1.0, %v3303_v16  ;;  %v2731_v33 = vsel %vm999_vm10, 1.0, %v3303_v16 }
 0x3bd   : > { %3008 = vperm.xlu0 %2955, %v3007_v10   ;;  %2993 = vperm.xlu1 %2956, %v2992_v11   ;;  %vm1007_vm5 = vcmp.eq.s32.totalorder %v3508_v6, %v594_v2  ;;  %vm1008_vm13 = vcmp.eq.s32.totalorder %v3508_v6, %v598_v3  ;;  %vm1002_vm6 = vcmp.eq.s32.totalorder %v3508_v6, %v574_v8  ;;  %v3651_v47 = vadd.s32 48, %v3352_v14 }
 0x3be   : > { %vm1003_vm9 = vcmp.eq.s32.totalorder %v3508_v6, %v578_v4  ;;  %v590_v59 = vrot.slane %v3506_v5, %v3395_v31  ;;  %v610_v34 = vrot.slane %v3581_v56, %v3383_v25  ;;  %v642_v35 = vrot.slane %v3600_v9, %v3383_v25 }
 0x3bf   : > { %v626_v36 = vrot.slane %v3600_v9, %v3365_v15  ;;  %v3027_v37 = vpack.i.bf16 %v2737_v30, %v2736_v28  ;;  %v3012_v38 = vpack.i.bf16 %v2731_v33, %v2729_v32  ;;  %v2739_v40 = vsel %vm1007_vm5, 1.0, %v3303_v16 }
 0x3c0   : > { %v2740_v41 = vsel %vm1008_vm13, 1.0, %v3303_v16  ;;  %v2734_v42 = vsel %vm1002_vm6, 1.0, %v3303_v16  ;;  %v2735_v43 = vsel %vm1003_vm9, 1.0, %v3303_v16  ;;  %vm1009_vm12 = vcmp.eq.s32.totalorder %v3508_v6, %v602_v18 }
 0x3c1   : > { %3018 = vperm.xlu0 %2955, %v3017_v24   ;;  %3003 = vperm.xlu1 %2956, %v3002_v26   ;;  %vm1017_vm7 = vcmp.eq.s32.totalorder %v3508_v6, %v634_v20  ;;  %vm998_vm8 = vcmp.eq.s32.totalorder %v3508_v6, %v558_v22  ;;  %vm1006_vm10 = vcmp.eq.s32.totalorder %v3508_v6, %v590_v59  ;;  %v2741_v52 = vsel %vm1009_vm12, 1.0, %v3303_v16 }
 0x3c2   : > { %v630_v5 = vrot.slane %v3600_v9, %v3371_v19  ;;  %v618_v44 = vrot.slane %v3581_v56, %v3391_v29  ;;  %v650_v45 = vrot.slane %v3600_v9, %v3391_v29  ;;  %v606_v46 = vrot.slane %v3581_v56, %v3379_v23 }
 0x3c3   : > { %v3037_v48 = vpack.i.bf16 %v2740_v41, %v2739_v40  ;;  %v3022_v49 = vpack.i.bf16 %v2735_v43, %v2734_v42  ;;  %v2749_v53 = vsel %vm1017_vm7, 1.0, %v3303_v16  ;;  %v2730_v51 = vsel %vm998_vm8, 1.0, %v3303_v16 }
 0x3c4   : > { %v2738_v54 = vsel %vm1006_vm10, 1.0, %v3303_v16  ;;  %vm1011_vm5 = vcmp.eq.s32.totalorder %v3508_v6, %v610_v34  ;;  %vm1019_vm13 = vcmp.eq.s32.totalorder %v3508_v6, %v642_v35  ;;  %vm1015_vm6 = vcmp.eq.s32.totalorder %v3508_v6, %v626_v36 }
 0x3c5   : > { %3028 = vperm.xlu0 %2955, %v3027_v37   ;;  %3013 = vperm.xlu1 %2956, %v3012_v38   ;;  %vm1016_vm9 = vcmp.eq.s32.totalorder %v3508_v6, %v630_v5  ;;  %v638_v55 = vrot.slane %v3600_v9, %v3379_v23  ;;  %v658_v39 = vrot.slane %v3651_v47, %v3365_v15  ;;  %v3670_v60 = vadd.s32 56, %v3352_v14 }
 0x3c6   : > { %v662_v57 = vrot.slane %v3651_v47, %v3371_v19  ;;  %v614_v58 = vrot.slane %v3581_v56, %v3387_v27  ;;  %v3047_v61 = vpack.i.bf16 %v2749_v53, %v2741_v52  ;;  %v3032_v62 = vpack.i.bf16 %v2738_v54, %v2730_v51 }
 0x3c7   : > { %v2743_v63 = vsel %vm1011_vm5, 1.0, %v3303_v16  ;;  %v2751_v1 = vsel %vm1019_vm13, 1.0, %v3303_v16  ;;  %v2747_v2 = vsel %vm1015_vm6, 1.0, %v3303_v16  ;;  %v2748_v3 = vsel %vm1016_vm9, 1.0, %v3303_v16 }
 0x3c8   : > { %vm1013_vm12 = vcmp.eq.s32.totalorder %v3508_v6, %v618_v44  ;;  %vm1021_vm7 = vcmp.eq.s32.totalorder %v3508_v6, %v650_v45  ;;  %vm1010_vm8 = vcmp.eq.s32.totalorder %v3508_v6, %v606_v46  ;;  %vm1018_vm10 = vcmp.eq.s32.totalorder %v3508_v6, %v638_v55 }
 0x3c9   : > { %3038 = vperm.xlu0 %2955, %v3037_v48   ;;  %3023 = vperm.xlu1 %2956, %v3022_v49   ;;  %v646_v8 = vrot.slane %v3600_v9, %v3387_v27  ;;  %v666_v10 = vrot.slane %v3651_v47, %v3375_v21  ;;  %v698_v11 = vrot.slane %v3670_v60, %v3375_v21  ;;  %v2745_v17 = vsel %vm1013_vm12, 1.0, %v3303_v16 }
 0x3ca   : > { %v622_v12 = vrot.slane %v3581_v56, %v3395_v31  ;;  %v3057_v13 = vpack.i.bf16 %v2751_v1, %v2743_v63  ;;  %v3042_v0 = vpack.i.bf16 %v2748_v3, %v2747_v2  ;;  %v2753_v4 = vsel %vm1021_vm7, 1.0, %v3303_v16 }
 0x3cb   : > { %v2742_v18 = vsel %vm1010_vm8, 1.0, %v3303_v16  ;;  %v2750_v20 = vsel %vm1018_vm10, 1.0, %v3303_v16  ;;  %vm1023_vm5 = vcmp.eq.s32.totalorder %v3508_v6, %v658_v39  ;;  %vm1024_vm13 = vcmp.eq.s32.totalorder %v3508_v6, %v662_v57 }
 0x3cc   : > { %vm1012_vm6 = vcmp.eq.s32.totalorder %v3508_v6, %v614_v58  ;;  %vm1020_vm9 = vcmp.eq.s32.totalorder %v3508_v6, %v646_v8  ;;  %v654_v56 = vrot.slane %v3600_v9, %v3395_v31  ;;  %v674_v22 = vrot.slane %v3651_v47, %v3383_v25 }
 0x3cd   : > { %3048 = vperm.xlu0 %2955, %v3047_v61   ;;  %3033 = vperm.xlu1 %2956, %v3032_v62   ;;  %v706_v24 = vrot.slane %v3670_v60, %v3383_v25  ;;  %v690_v26 = vrot.slane %v3670_v60, %v3365_v15  ;;  %v3067_v28 = vpack.i.bf16 %v2753_v4, %v2745_v17  ;;  %v2755_v32 = vsel %vm1023_vm5, 1.0, %v3303_v16 }
 0x3ce   : > { %v3052_v30 = vpack.i.bf16 %v2750_v20, %v2742_v18  ;;  %v2756_v33 = vsel %vm1024_vm13, 1.0, %v3303_v16  ;;  %v2744_v59 = vsel %vm1012_vm6, 1.0, %v3303_v16  ;;  %v2752_v34 = vsel %vm1020_vm9, 1.0, %v3303_v16 }
 0x3cf   : > { %vm1025_vm12 = vcmp.eq.s32.totalorder %v3508_v6, %v666_v10  ;;  %vm1033_vm7 = vcmp.eq.s32.totalorder %v3508_v6, %v698_v11  ;;  %vm1014_vm8 = vcmp.eq.s32.totalorder %v3508_v6, %v622_v12  ;;  %vm1022_vm10 = vcmp.eq.s32.totalorder %v3508_v6, %v654_v56 }
 0x3d0   : > { %v694_v9 = vrot.slane %v3670_v60, %v3371_v19  ;;  %v682_v35 = vrot.slane %v3651_v47, %v3391_v29  ;;  %v714_v36 = vrot.slane %v3670_v60, %v3391_v29  ;;  %v670_v37 = vrot.slane %v3651_v47, %v3379_v23 }
 0x3d1   : > { %3058 = vperm.xlu0 %2955, %v3057_v13   ;;  %3043 = vperm.xlu1 %2956, %v3042_v0   ;;  %v3721_v38 = vadd.s32 64, %v3352_v14  ;;  %v3077_v40 = vpack.i.bf16 %v2756_v33, %v2755_v32  ;;  %v3062_v41 = vpack.i.bf16 %v2752_v34, %v2744_v59  ;;  %v2757_v42 = vsel %vm1025_vm12, 1.0, %v3303_v16 }
 0x3d2   : > { %v2765_v43 = vsel %vm1033_vm7, 1.0, %v3303_v16  ;;  %v2746_v5 = vsel %vm1014_vm8, 1.0, %v3303_v16  ;;  %v2754_v44 = vsel %vm1022_vm10, 1.0, %v3303_v16  ;;  %vm1027_vm5 = vcmp.eq.s32.totalorder %v3508_v6, %v674_v22 }
 0x3d3   : > { %vm1035_vm13 = vcmp.eq.s32.totalorder %v3508_v6, %v706_v24  ;;  %vm1031_vm6 = vcmp.eq.s32.totalorder %v3508_v6, %v690_v26  ;;  %vm1032_vm9 = vcmp.eq.s32.totalorder %v3508_v6, %v694_v9  ;;  %v702_v45 = vrot.slane %v3670_v60, %v3379_v23 }
 0x3d4   : > { %v722_v46 = vrot.slane %v3721_v38, %v3365_v15  ;;  %v726_v48 = vrot.slane %v3721_v38, %v3371_v19  ;;  %v678_v49 = vrot.slane %v3651_v47, %v3387_v27  ;;  %v3740_v52 = vadd.s32 72, %v3352_v14 }
 0x3d5   : > { %3068 = vperm.xlu0 %2955, %v3067_v28   ;;  %3053 = vperm.xlu1 %2956, %v3052_v30   ;;  %v3087_v53 = vpack.i.bf16 %v2765_v43, %v2757_v42  ;;  %v3072_v51 = vpack.i.bf16 %v2754_v44, %v2746_v5  ;;  %v2759_v54 = vsel %vm1027_vm5, 1.0, %v3303_v16  ;;  %v2767_v55 = vsel %vm1035_vm13, 1.0, %v3303_v16 }
 0x3d6   : > { %v2763_v39 = vsel %vm1031_vm6, 1.0, %v3303_v16  ;;  %v2764_v57 = vsel %vm1032_vm9, 1.0, %v3303_v16  ;;  %vm1029_vm12 = vcmp.eq.s32.totalorder %v3508_v6, %v682_v35  ;;  %vm1037_vm7 = vcmp.eq.s32.totalorder %v3508_v6, %v714_v36 }
 0x3d7   : > { %vm1026_vm8 = vcmp.eq.s32.totalorder %v3508_v6, %v670_v37  ;;  %vm1034_vm10 = vcmp.eq.s32.totalorder %v3508_v6, %v702_v45  ;;  %v710_v58 = vrot.slane %v3670_v60, %v3387_v27  ;;  %v730_v61 = vrot.slane %v3721_v38, %v3375_v21 }
 0x3d8   : > { %v762_v62 = vrot.slane %v3740_v52, %v3375_v21  ;;  %v686_v63 = vrot.slane %v3651_v47, %v3395_v31  ;;  %v3097_v1 = vpack.i.bf16 %v2767_v55, %v2759_v54  ;;  %v3082_v2 = vpack.i.bf16 %v2764_v57, %v2763_v39 }
 0x3d9   : > { %3078 = vperm.xlu0 %2955, %v3077_v40   ;;  %3063 = vperm.xlu1 %2956, %v3062_v41   ;;  %v2761_v3 = vsel %vm1029_vm12, 1.0, %v3303_v16  ;;  %v2769_v8 = vsel %vm1037_vm7, 1.0, %v3303_v16  ;;  %v2758_v10 = vsel %vm1026_vm8, 1.0, %v3303_v16  ;;  %v2766_v11 = vsel %vm1034_vm10, 1.0, %v3303_v16 }
 0x3da   : > { %vm1039_vm5 = vcmp.eq.s32.totalorder %v3508_v6, %v722_v46  ;;  %vm1040_vm13 = vcmp.eq.s32.totalorder %v3508_v6, %v726_v48  ;;  %vm1028_vm6 = vcmp.eq.s32.totalorder %v3508_v6, %v678_v49  ;;  %vm1036_vm9 = vcmp.eq.s32.totalorder %v3508_v6, %v710_v58 }
 0x3db   : > { %v718_v47 = vrot.slane %v3670_v60, %v3395_v31  ;;  %v738_v12 = vrot.slane %v3721_v38, %v3383_v25  ;;  %v770_v13 = vrot.slane %v3740_v52, %v3383_v25  ;;  %v754_v0 = vrot.slane %v3740_v52, %v3365_v15 }
 0x3dc   : > { %v3107_v17 = vpack.i.bf16 %v2769_v8, %v2761_v3  ;;  %v3092_v4 = vpack.i.bf16 %v2766_v11, %v2758_v10  ;;  %v2771_v18 = vsel %vm1039_vm5, 1.0, %v3303_v16  ;;  %v2772_v20 = vsel %vm1040_vm13, 1.0, %v3303_v16 }
 0x3dd   : > { %3088 = vperm.xlu0 %2955, %v3087_v53   ;;  %3073 = vperm.xlu1 %2956, %v3072_v51   ;;  %v2760_v56 = vsel %vm1028_vm6, 1.0, %v3303_v16  ;;  %v2768_v22 = vsel %vm1036_vm9, 1.0, %v3303_v16  ;;  %vm1041_vm12 = vcmp.eq.s32.totalorder %v3508_v6, %v730_v61  ;;  %vm1049_vm7 = vcmp.eq.s32.totalorder %v3508_v6, %v762_v62 }
 0x3de   : > { %vm1030_vm8 = vcmp.eq.s32.totalorder %v3508_v6, %v686_v63  ;;  %vm1038_vm10 = vcmp.eq.s32.totalorder %v3508_v6, %v718_v47  ;;  %v758_v60 = vrot.slane %v3740_v52, %v3371_v19  ;;  %v746_v24 = vrot.slane %v3721_v38, %v3391_v29 }
 0x3df   : > { %v778_v26 = vrot.slane %v3740_v52, %v3391_v29  ;;  %v734_v28 = vrot.slane %v3721_v38, %v3379_v23  ;;  %v3791_v30 = vadd.s32 80, %v3352_v14  ;;  %v3117_v32 = vpack.i.bf16 %v2772_v20, %v2771_v18 }
 0x3e0   : > { %v3102_v33 = vpack.i.bf16 %v2768_v22, %v2760_v56  ;;  %v2773_v59 = vsel %vm1041_vm12, 1.0, %v3303_v16  ;;  %v2781_v34 = vsel %vm1049_vm7, 1.0, %v3303_v16  ;;  %v2762_v9 = vsel %vm1030_vm8, 1.0, %v3303_v16 }
 0x3e1   : > { %3098 = vperm.xlu0 %2955, %v3097_v1   ;;  %3083 = vperm.xlu1 %2956, %v3082_v2   ;;  %v2770_v35 = vsel %vm1038_vm10, 1.0, %v3303_v16  ;;  %vm1043_vm5 = vcmp.eq.s32.totalorder %v3508_v6, %v738_v12  ;;  %vm1051_vm13 = vcmp.eq.s32.totalorder %v3508_v6, %v770_v13  ;;  %vm1047_vm6 = vcmp.eq.s32.totalorder %v3508_v6, %v754_v0 }
 0x3e2   : > { %vm1048_vm9 = vcmp.eq.s32.totalorder %v3508_v6, %v758_v60  ;;  %v766_v36 = vrot.slane %v3740_v52, %v3379_v23  ;;  %v786_v37 = vrot.slane %v3791_v30, %v3365_v15  ;;  %v790_v40 = vrot.slane %v3791_v30, %v3371_v19 }
 0x3e3   : > { %v742_v41 = vrot.slane %v3721_v38, %v3387_v27  ;;  %v3810_v42 = vadd.s32 88, %v3352_v14  ;;  %v3127_v43 = vpack.i.bf16 %v2781_v34, %v2773_v59  ;;  %v3112_v5 = vpack.i.bf16 %v2770_v35, %v2762_v9 }
 0x3e4   : > { %v2775_v44 = vsel %vm1043_vm5, 1.0, %v3303_v16  ;;  %v2783_v45 = vsel %vm1051_vm13, 1.0, %v3303_v16  ;;  %v2779_v46 = vsel %vm1047_vm6, 1.0, %v3303_v16  ;;  %v2780_v48 = vsel %vm1048_vm9, 1.0, %v3303_v16 }
 0x3e5   : > { %3108 = vperm.xlu0 %2955, %v3107_v17   ;;  %3093 = vperm.xlu1 %2956, %v3092_v4   ;;  %vm1045_vm12 = vcmp.eq.s32.totalorder %v3508_v6, %v746_v24  ;;  %vm1053_vm7 = vcmp.eq.s32.totalorder %v3508_v6, %v778_v26  ;;  %vm1042_vm8 = vcmp.eq.s32.totalorder %v3508_v6, %v734_v28  ;;  %v3863_v18 = vadd.s32 96, %v3352_v14 }
 0x3e6   : > { %vm1050_vm10 = vcmp.eq.s32.totalorder %v3508_v6, %v766_v36  ;;  %v774_v49 = vrot.slane %v3740_v52, %v3387_v27  ;;  %v794_v53 = vrot.slane %v3791_v30, %v3375_v21  ;;  %v826_v51 = vrot.slane %v3810_v42, %v3375_v21 }
 0x3e7   : > { %v750_v54 = vrot.slane %v3721_v38, %v3395_v31  ;;  %v3137_v55 = vpack.i.bf16 %v2783_v45, %v2775_v44  ;;  %v3122_v39 = vpack.i.bf16 %v2780_v48, %v2779_v46  ;;  %v2777_v57 = vsel %vm1045_vm12, 1.0, %v3303_v16 }
 0x3e8   : > { %v2785_v58 = vsel %vm1053_vm7, 1.0, %v3303_v16  ;;  %v2774_v61 = vsel %vm1042_vm8, 1.0, %v3303_v16  ;;  %v2782_v62 = vsel %vm1050_vm10, 1.0, %v3303_v16  ;;  %vm1055_vm5 = vcmp.eq.s32.totalorder %v3508_v6, %v786_v37 }
 0x3e9   : > { %3118 = vperm.xlu0 %2955, %v3117_v32   ;;  %3103 = vperm.xlu1 %2956, %v3102_v33   ;;  %vm1056_vm13 = vcmp.eq.s32.totalorder %v3508_v6, %v790_v40  ;;  %vm1044_vm6 = vcmp.eq.s32.totalorder %v3508_v6, %v742_v41  ;;  %vm1052_vm9 = vcmp.eq.s32.totalorder %v3508_v6, %v774_v49  ;;  %v2787_v11 = vsel %vm1055_vm5, 1.0, %v3303_v16 }
 0x3ea   : > { %v782_v38 = vrot.slane %v3740_v52, %v3395_v31  ;;  %v802_v63 = vrot.slane %v3791_v30, %v3383_v25  ;;  %v834_v1 = vrot.slane %v3810_v42, %v3383_v25  ;;  %v818_v2 = vrot.slane %v3810_v42, %v3365_v15 }
 0x3eb   : > { %v822_v3 = vrot.slane %v3810_v42, %v3371_v19  ;;  %v3147_v8 = vpack.i.bf16 %v2785_v58, %v2777_v57  ;;  %v3132_v10 = vpack.i.bf16 %v2782_v62, %v2774_v61  ;;  %v2788_v47 = vsel %vm1056_vm13, 1.0, %v3303_v16 }
 0x3ec   : > { %v2776_v52 = vsel %vm1044_vm6, 1.0, %v3303_v16  ;;  %v2784_v12 = vsel %vm1052_vm9, 1.0, %v3303_v16  ;;  %vm1057_vm12 = vcmp.eq.s32.totalorder %v3508_v6, %v794_v53  ;;  %vm1065_vm7 = vcmp.eq.s32.totalorder %v3508_v6, %v826_v51 }
 0x3ed   : > { %3128 = vperm.xlu0 %2955, %v3127_v43   ;;  %3113 = vperm.xlu1 %2956, %v3112_v5   ;;  %vm1046_vm8 = vcmp.eq.s32.totalorder %v3508_v6, %v750_v54  ;;  %vm1054_vm10 = vcmp.eq.s32.totalorder %v3508_v6, %v782_v38  ;;  %v810_v13 = vrot.slane %v3791_v30, %v3391_v29  ;;  %v2789_v22 = vsel %vm1057_vm12, 1.0, %v3303_v16 }
 0x3ee   : > { %v842_v0 = vrot.slane %v3810_v42, %v3391_v29  ;;  %v798_v17 = vrot.slane %v3791_v30, %v3379_v23  ;;  %v830_v4 = vrot.slane %v3810_v42, %v3379_v23  ;;  %v3157_v20 = vpack.i.bf16 %v2788_v47, %v2787_v11 }
 0x3ef   : > { %v3142_v56 = vpack.i.bf16 %v2784_v12, %v2776_v52  ;;  %v2797_v60 = vsel %vm1065_vm7, 1.0, %v3303_v16  ;;  %v2778_v24 = vsel %vm1046_vm8, 1.0, %v3303_v16  ;;  %v2786_v26 = vsel %vm1054_vm10, 1.0, %v3303_v16 }
 0x3f0   : > { %vm1059_vm5 = vcmp.eq.s32.totalorder %v3508_v6, %v802_v63  ;;  %vm1067_vm13 = vcmp.eq.s32.totalorder %v3508_v6, %v834_v1  ;;  %vm1063_vm6 = vcmp.eq.s32.totalorder %v3508_v6, %v818_v2  ;;  %vm1064_vm9 = vcmp.eq.s32.totalorder %v3508_v6, %v822_v3 }
 0x3f1   : > { %3138 = vperm.xlu0 %2955, %v3137_v55   ;;  %3123 = vperm.xlu1 %2956, %v3122_v39   ;;  %v850_v28 = vrot.slane %v3863_v18, %v3365_v15  ;;  %v854_v32 = vrot.slane %v3863_v18, %v3371_v19  ;;  %v806_v33 = vrot.slane %v3791_v30, %v3387_v27  ;;  %v3880_v59 = vadd.s32 104, %v3352_v14 }
 0x3f2   : > { %v3304_v34 = vmov 0.0|0.0   ;;  %v3167_v9 = vpack.i.bf16 %v2797_v60, %v2789_v22  ;;  %v3152_v35 = vpack.i.bf16 %v2786_v26, %v2778_v24  ;;  %v2791_v36 = vsel %vm1059_vm5, 1.0, %v3303_v16 }
 0x3f3   : > { %2906 = vmatprep.subr.bf16.mxu0 %v3304_v34  ;;  %v838_v37 = vrot.slane %v3810_v42, %v3387_v27  ;;  %v2799_v40 = vsel %vm1067_vm13, 1.0, %v3303_v16  ;;  %v2795_v41 = vsel %vm1063_vm6, 1.0, %v3303_v16  ;;  %v2796_v43 = vsel %vm1064_vm9, 1.0, %v3303_v16 }
 0x3f4   : > { %vm1061_vm12 = vcmp.eq.s32.totalorder %v3508_v6, %v810_v13  ;;  %vm1069_vm7 = vcmp.eq.s32.totalorder %v3508_v6, %v842_v0  ;;  %vm1058_vm8 = vcmp.eq.s32.totalorder %v3508_v6, %v798_v17  ;;  %vm1066_vm10 = vcmp.eq.s32.totalorder %v3508_v6, %v830_v4 }
 0x3f5   : > { %3148 = vperm.xlu0 %2955, %v3147_v8   ;;  %3133 = vperm.xlu1 %2956, %v3132_v10   ;;  %v858_v5 = vrot.slane %v3863_v18, %v3375_v21  ;;  %v890_v44 = vrot.slane %v3880_v59, %v3375_v21  ;;  %v814_v45 = vrot.slane %v3791_v30, %v3395_v31  ;;  %v2793_v49 = vsel %vm1061_vm12, 1.0, %v3303_v16 }
 0x3f6   : > { %v3177_v46 = vpack.i.bf16 %v2799_v40, %v2791_v36  ;;  %v3162_v48 = vpack.i.bf16 %v2796_v43, %v2795_v41  ;;  %v846_v53 = vrot.slane %v3810_v42, %v3395_v31  ;;  %v2801_v51 = vsel %vm1069_vm7, 1.0, %v3303_v16 }
 0x3f7   : > { %v2790_v54 = vsel %vm1058_vm8, 1.0, %v3303_v16  ;;  %v2798_v55 = vsel %vm1066_vm10, 1.0, %v3303_v16  ;;  %vm1071_vm5 = vcmp.eq.s32.totalorder %v3508_v6, %v850_v28  ;;  %vm1072_vm13 = vcmp.eq.s32.totalorder %v3508_v6, %v854_v32 }
 0x3f8   : > { %vm1060_vm6 = vcmp.eq.s32.totalorder %v3508_v6, %v806_v33  ;;  %vm1068_vm9 = vcmp.eq.s32.totalorder %v3508_v6, %v838_v37  ;;  %v866_v30 = vrot.slane %v3863_v18, %v3383_v25  ;;  %v898_v42 = vrot.slane %v3880_v59, %v3383_v25 }
 0x3f9   : > { %3158 = vperm.xlu0 %2955, %v3157_v20   ;;  %3143 = vperm.xlu1 %2956, %v3142_v56   ;;  %v882_v39 = vrot.slane %v3880_v59, %v3365_v15  ;;  %v3187_v57 = vpack.i.bf16 %v2801_v51, %v2793_v49  ;;  %v3172_v58 = vpack.i.bf16 %v2798_v55, %v2790_v54  ;;  %v2803_v61 = vsel %vm1071_vm5, 1.0, %v3303_v16 }
 0x3fa   : > { %v886_v62 = vrot.slane %v3880_v59, %v3371_v19  ;;  %v2804_v38 = vsel %vm1072_vm13, 1.0, %v3303_v16  ;;  %v2792_v63 = vsel %vm1060_vm6, 1.0, %v3303_v16  ;;  %v2800_v1 = vsel %vm1068_vm9, 1.0, %v3303_v16 }
 0x3fb   : > { %vm1073_vm12 = vcmp.eq.s32.totalorder %v3508_v6, %v858_v5  ;;  %vm1081_vm7 = vcmp.eq.s32.totalorder %v3508_v6, %v890_v44  ;;  %vm1062_vm8 = vcmp.eq.s32.totalorder %v3508_v6, %v814_v45  ;;  %vm1070_vm10 = vcmp.eq.s32.totalorder %v3508_v6, %v846_v53 }
 0x3fc   : > { %v874_v2 = vrot.slane %v3863_v18, %v3391_v29  ;;  %v906_v3 = vrot.slane %v3880_v59, %v3391_v29  ;;  %v862_v8 = vrot.slane %v3863_v18, %v3379_v23  ;;  %v3932_v10 = vadd.s32 112, %v3352_v14 }
 0x3fd   : > { %3168 = vperm.xlu0 %2955, %v3167_v9   ;;  %3153 = vperm.xlu1 %2956, %v3152_v35   ;;  %v3197_v11 = vpack.i.bf16 %v2804_v38, %v2803_v61  ;;  %v3182_v47 = vpack.i.bf16 %v2800_v1, %v2792_v63  ;;  %v2805_v52 = vsel %vm1073_vm12, 1.0, %v3303_v16  ;;  %v894_v12 = vrot.slane %v3880_v59, %v3379_v23 }
 0x3fe   : > { %v2813_v13 = vsel %vm1081_vm7, 1.0, %v3303_v16  ;;  %v2794_v0 = vsel %vm1062_vm8, 1.0, %v3303_v16  ;;  %v2802_v17 = vsel %vm1070_vm10, 1.0, %v3303_v16  ;;  %vm1075_vm5 = vcmp.eq.s32.totalorder %v3508_v6, %v866_v30 }
 0x3ff   : > { %vm1083_vm13 = vcmp.eq.s32.totalorder %v3508_v6, %v898_v42  ;;  %vm1079_vm6 = vcmp.eq.s32.totalorder %v3508_v6, %v882_v39  ;;  %vm1080_vm9 = vcmp.eq.s32.totalorder %v3508_v6, %v886_v62  ;;  %v914_v4 = vrot.slane %v3932_v10, %v3365_v15 }
 0x400   : > { %v918_v20 = vrot.slane %v3932_v10, %v3371_v19  ;;  %v870_v56 = vrot.slane %v3863_v18, %v3387_v27  ;;  %v3951_v22 = vadd.s32 120, %v3352_v14  ;;  %v3207_v60 = vpack.i.bf16 %v2813_v13, %v2805_v52 }
 0x401   : > { %3178 = vperm.xlu0 %2955, %v3177_v46   ;;  %3163 = vperm.xlu1 %2956, %v3162_v48   ;;  %v3192_v24 = vpack.i.bf16 %v2802_v17, %v2794_v0  ;;  %v2807_v26 = vsel %vm1075_vm5, 1.0, %v3303_v16  ;;  %v902_v28 = vrot.slane %v3880_v59, %v3387_v27  ;;  %v2815_v32 = vsel %vm1083_vm13, 1.0, %v3303_v16 }
 0x402   : > { %v2811_v33 = vsel %vm1079_vm6, 1.0, %v3303_v16  ;;  %v2812_v9 = vsel %vm1080_vm9, 1.0, %v3303_v16  ;;  %vm1077_vm12 = vcmp.eq.s32.totalorder %v3508_v6, %v874_v2  ;;  %vm1085_vm7 = vcmp.eq.s32.totalorder %v3508_v6, %v906_v3 }
 0x403   : > { %vm1074_vm8 = vcmp.eq.s32.totalorder %v3508_v6, %v862_v8  ;;  %vm1082_vm10 = vcmp.eq.s32.totalorder %v3508_v6, %v894_v12  ;;  %v922_v14 = vrot.slane %v3932_v10, %v3375_v21  ;;  %v954_v35 = vrot.slane %v3951_v22, %v3375_v21 }
 0x404   : > { %v878_v36 = vrot.slane %v3863_v18, %v3395_v31  ;;  %v3217_v37 = vpack.i.bf16 %v2815_v32, %v2807_v26  ;;  %v3202_v40 = vpack.i.bf16 %v2812_v9, %v2811_v33  ;;  %v2809_v41 = vsel %vm1077_vm12, 1.0, %v3303_v16 }
 0x405   : > { %3188 = vperm.xlu0 %2955, %v3187_v57   ;;  %3173 = vperm.xlu1 %2956, %v3172_v58   ;;  %v910_v43 = vrot.slane %v3880_v59, %v3395_v31  ;;  %v2817_v5 = vsel %vm1085_vm7, 1.0, %v3303_v16  ;;  %v2806_v44 = vsel %vm1074_vm8, 1.0, %v3303_v16  ;;  %v2814_v45 = vsel %vm1082_vm10, 1.0, %v3303_v16 }
 0x406   : > { %vm1087_vm5 = vcmp.eq.s32.totalorder %v3508_v6, %v914_v4  ;;  %vm1088_vm13 = vcmp.eq.s32.totalorder %v3508_v6, %v918_v20  ;;  %vm1076_vm6 = vcmp.eq.s32.totalorder %v3508_v6, %v870_v56  ;;  %vm1084_vm9 = vcmp.eq.s32.totalorder %v3508_v6, %v902_v28 }
 0x407   : > { %v930_v21 = vrot.slane %v3932_v10, %v3383_v25  ;;  %v962_v18 = vrot.slane %v3951_v22, %v3383_v25  ;;  %v946_v59 = vrot.slane %v3951_v22, %v3365_v15  ;;  %v3227_v46 = vpack.i.bf16 %v2817_v5, %v2809_v41 }
 0x408   : > { %v3212_v48 = vpack.i.bf16 %v2814_v45, %v2806_v44  ;;  %v2819_v49 = vsel %vm1087_vm5, 1.0, %v3303_v16  ;;  %v950_v53 = vrot.slane %v3951_v22, %v3371_v19  ;;  %v2820_v51 = vsel %vm1088_vm13, 1.0, %v3303_v16 }
 0x409   : > { %3198 = vperm.xlu0 %2955, %v3197_v11   ;;  %3183 = vperm.xlu1 %2956, %v3182_v47   ;;  %v2808_v54 = vsel %vm1076_vm6, 1.0, %v3303_v16  ;;  %v2816_v55 = vsel %vm1084_vm9, 1.0, %v3303_v16  ;;  %vm1089_vm12 = vcmp.eq.s32.totalorder %v3508_v6, %v922_v14  ;;  %vm1097_vm7 = vcmp.eq.s32.totalorder %v3508_v6, %v954_v35 }
 0x40a   : > { %vm1078_vm8 = vcmp.eq.s32.totalorder %v3508_v6, %v878_v36  ;;  %vm1086_vm10 = vcmp.eq.s32.totalorder %v3508_v6, %v910_v43  ;;  %v938_v15 = vrot.slane %v3932_v10, %v3391_v29  ;;  %v970_v19 = vrot.slane %v3951_v22, %v3391_v29 }
 0x40b   : > { %v926_v25 = vrot.slane %v3932_v10, %v3379_v23  ;;  %v3237_v30 = vpack.i.bf16 %v2820_v51, %v2819_v49  ;;  %v3222_v42 = vpack.i.bf16 %v2816_v55, %v2808_v54  ;;  %v2821_v39 = vsel %vm1089_vm12, 1.0, %v3303_v16 }
 0x40c   : > { %v958_v57 = vrot.slane %v3951_v22, %v3379_v23  ;;  %v2829_v58 = vsel %vm1097_vm7, 1.0, %v3303_v16  ;;  %v2810_v61 = vsel %vm1078_vm8, 1.0, %v3303_v16  ;;  %v2818_v62 = vsel %vm1086_vm10, 1.0, %v3303_v16 }
 0x40d   : > { %3208 = vperm.xlu0 %2955, %v3207_v60   ;;  %3193 = vperm.xlu1 %2956, %v3192_v24   ;;  %vm1091_vm5 = vcmp.eq.s32.totalorder %v3508_v6, %v930_v21  ;;  %vm1099_vm13 = vcmp.eq.s32.totalorder %v3508_v6, %v962_v18  ;;  %vm1095_vm6 = vcmp.eq.s32.totalorder %v3508_v6, %v946_v59 }
 0x40e   : > { %vm1096_vm9 = vcmp.eq.s32.totalorder %v3508_v6, %v950_v53  ;;  %v934_v29 = vrot.slane %v3932_v10, %v3387_v27  ;;  %v3247_v23 = vpack.i.bf16 %v2829_v58, %v2821_v39  ;;  %v3232_v38 = vpack.i.bf16 %v2818_v62, %v2810_v61 }
 0x40f   : > { %v2823_v63 = vsel %vm1091_vm5, 1.0, %v3303_v16  ;;  %v966_v1 = vrot.slane %v3951_v22, %v3387_v27  ;;  %v2831_v2 = vsel %vm1099_vm13, 1.0, %v3303_v16  ;;  %v2827_v3 = vsel %vm1095_vm6, 1.0, %v3303_v16 }
 0x410   : > { %v2828_v8 = vsel %vm1096_vm9, 1.0, %v3303_v16  ;;  %vm1093_vm12 = vcmp.eq.s32.totalorder %v3508_v6, %v938_v15  ;;  %vm1101_vm7 = vcmp.eq.s32.totalorder %v3508_v6, %v970_v19  ;;  %vm1090_vm8 = vcmp.eq.s32.totalorder %v3508_v6, %v926_v25 }
 0x411   : > { %3218 = vperm.xlu0 %2955, %v3217_v37   ;;  %3203 = vperm.xlu1 %2956, %v3202_v40   ;;  %vm1098_vm10 = vcmp.eq.s32.totalorder %v3508_v6, %v958_v57  ;;  %v3257_v11 = vpack.i.bf16 %v2831_v2, %v2823_v63  ;;  %v3242_v47 = vpack.i.bf16 %v2828_v8, %v2827_v3  ;;  %v2825_v52 = vsel %vm1093_vm12, 1.0, %v3303_v16 }
 0x412   : > { %v942_v27 = vrot.slane %v3932_v10, %v3395_v31  ;;  %v2833_v12 = vsel %vm1101_vm7, 1.0, %v3303_v16  ;;  %v2822_v13 = vsel %vm1090_vm8, 1.0, %v3303_v16  ;;  %v2830_v0 = vsel %vm1098_vm10, 1.0, %v3303_v16  ;;  %vm4076_vm7 = vmpackc.low %vm434_vm4, %vm434_vm4 }
 0x413   : > { %vm1092_vm5 = vcmp.eq.s32.totalorder %v3508_v6, %v934_v29  ;;  %vm1100_vm13 = vcmp.eq.s32.totalorder %v3508_v6, %v966_v1  ;;  %v974_v17 = vrot.slane %v3951_v22, %v3395_v31  ;;  %v3267_v4 = vpack.i.bf16 %v2833_v12, %v2825_v52 }
 0x414   : > { %v3252_v20 = vpack.i.bf16 %v2830_v0, %v2822_v13  ;;  %v2824_v10 = vsel %vm1092_vm5, 1.0, %v3303_v16  ;;  %v2832_v56 = vsel %vm1100_vm13, 1.0, %v3303_v16  ;;  %vm1094_vm6 = vcmp.eq.s32.totalorder %v3508_v6, %v942_v27 }
 0x415   : > { %3228 = vperm.xlu0 %2955, %v3227_v46   ;;  %3213 = vperm.xlu1 %2956, %v3212_v48   ;;  %vm1102_vm9 = vcmp.eq.s32.totalorder %v3508_v6, %v974_v17  ;;  %v3262_v60 = vpack.i.bf16 %v2832_v56, %v2824_v10  ;;  %v2826_v24 = vsel %vm1094_vm6, 1.0, %v3303_v16  ;;  %vm3305_vm12 = vmmov 0  }
 0x416   : > { %v2834_v26 = vsel %vm1102_vm9, 1.0, %v3303_v16  ;;  %2903 = vmatprep.mubr.msk.f32.mxu0 %vm3305_vm12, %v3303_v16 }
 0x417   : > { %v3272_v28 = vpack.i.bf16 %v2834_v26, %v2826_v24 }
 0x419   : > { %3238 = vperm.xlu0 %2955, %v3237_v30   ;;  %3223 = vperm.xlu1 %2956, %v3222_v42  }
 0x41d   : > { %3248 = vperm.xlu0 %2955, %v3247_v23   ;;  %3233 = vperm.xlu1 %2956, %v3232_v38  }
 0x421   : > { %3258 = vperm.xlu0 %2955, %v3257_v11   ;;  %3243 = vperm.xlu1 %2956, %v3242_v47  }
 0x425   : > { %3268 = vperm.xlu0 %2955, %v3267_v4   ;;  %3253 = vperm.xlu1 %2956, %v3252_v20  }
 0x429   : > { %3263 = vperm.xlu1 %2956, %v3262_v60  }
 0x42c   : > { %v2969_v31 = vpop.permute.xlu0 %2968  ;;  %v2959_v22 = vpop.permute.xlu1 %2958 }
 0x42d   : > { %v2961_v32 = vunpack.i.h.bf16 %v2959_v22  ;;  %v2960_v33 = vunpack.i.l.bf16 %v2959_v22  ;;  %3273 = vperm.xlu1 %2956, %v3272_v28   ;;  %v2970_v18 = vunpack.i.l.bf16 %v2969_v31  ;;  %v2971_v46 = vunpack.i.h.bf16 %v2969_v31 }
 0x42f   : > { %v1896_v35 = vrot.slane %v2961_v32, %v3454_v7  ;;  %v1892_v36 = vrot.slane %v2960_v33, %v3454_v7  ;;  %v1908_v30 = vrot.slane %v2970_v18, %v3454_v7  ;;  %v1912_v58 = vrot.slane %v2971_v46, %v3454_v7 }
 0x430   : > { %v2979_v9 = vpop.permute.xlu0 %2978  ;;  %v2964_v14 = vpop.permute.xlu1 %2963 }
 0x431   : > { %v2966_v37 = vunpack.i.h.bf16 %v2964_v14  ;;  %v2965_v6 = vunpack.i.l.bf16 %v2964_v14  ;;  %v2981_v40 = vunpack.i.h.bf16 %v2979_v9  ;;  %v2980_v41 = vunpack.i.l.bf16 %v2979_v9 }
 0x432   : > { %v2401_v45 = vsel %vm420_vm14, %v1896_v35, %v1892_v36 }
 0x433   : > { %v1900_v43 = vrot.slane %v2965_v6, %v3454_v7  ;;  %v1904_v21 = vrot.slane %v2966_v37, %v3454_v7  ;;  %v1928_v48 = vrot.slane %v2981_v40, %v3454_v7  ;;  %v1924_v49 = vrot.slane %v2980_v41, %v3454_v7 }
 0x434   : > { %v2989_v5 = vpop.permute.xlu0 %2988  ;;  %v2974_v44 = vpop.permute.xlu1 %2973 }
 0x435   : > { %v2402_v59 = vsel %vm422_vm15, %v1900_v43, %v2401_v45  ;;  %v2991_v53 = vunpack.i.h.bf16 %v2989_v5  ;;  %v2990_v15 = vunpack.i.l.bf16 %v2989_v5  ;;  %v2975_v42 = vunpack.i.l.bf16 %v2974_v44 }
 0x436   : > { %v2403_v55 = vsel %vm424_vm0, %v1904_v21, %v2402_v59  ;;  %v2408_v61 = vsel %vm420_vm14, %v1928_v48, %v1924_v49  ;;  %v2976_v2 = vunpack.i.h.bf16 %v2974_v44 }
 0x437   : > { %v2404_v62 = vsel %vm426_vm1, %v1908_v30, %v2403_v55  ;;  %v1944_v63 = vrot.slane %v2991_v53, %v3454_v7  ;;  %v1940_v1 = vrot.slane %v2990_v15, %v3454_v7  ;;  %v1916_v8 = vrot.slane %v2975_v42, %v3454_v7 }
 0x438   : > { %v2999_v51 = vpop.permute.xlu0 %2998  ;;  %v2984_v54 = vpop.permute.xlu1 %2983  ;;  %v2405_v13 = vsel %vm428_vm3, %v1912_v58, %v2404_v62  ;;  %v1920_v60 = vrot.slane %v2976_v2, %v3454_v7 }
 0x439   : > { %v2986_v19 = vunpack.i.h.bf16 %v2984_v54  ;;  %v2985_v25 = vunpack.i.l.bf16 %v2984_v54  ;;  %v3001_v16 = vunpack.i.h.bf16 %v2999_v51  ;;  %v3000_v29 = vunpack.i.l.bf16 %v2999_v51 }
 0x43a   : > { %v2406_v28 = vsel %vm430_vm11, %v1916_v8, %v2405_v13 }
 0x43b   : > { %v1936_v39 = vrot.slane %v2986_v19, %v3454_v7  ;;  %v1932_v57 = vrot.slane %v2985_v25, %v3454_v7  ;;  %v1960_v52 = vrot.slane %v3001_v16, %v3454_v7  ;;  %v1956_v0 = vrot.slane %v3000_v29, %v3454_v7 }
 0x43c   : > { %v3009_v23 = vpop.permute.xlu0 %3008  ;;  %v2994_v38 = vpop.permute.xlu1 %2993  ;;  %v2407_v43 = vsel %vm432_vm2, %v1920_v60, %v2406_v28 }
 0x43d   : > { %v2409_v3 = vsel %vm422_vm15, %v1932_v57, %v2408_v61  ;;  %v2996_v47 = vunpack.i.h.bf16 %v2994_v38  ;;  %v2995_v27 = vunpack.i.l.bf16 %v2994_v38  ;;  %v2415_v32 = vsel %vm420_vm14, %v1960_v52, %v1956_v0 }
 0x43e   : > { %v2410_v11 = vsel %vm424_vm0, %v1936_v39, %v2409_v3  ;;  %v3010_v6 = vunpack.i.l.bf16 %v3009_v23  ;;  %v3011_v21 = vunpack.i.h.bf16 %v3009_v23 }
 0x43f   : > { %v2411_v12 = vsel %vm426_vm1, %v1940_v1, %v2410_v11  ;;  %v1952_v17 = vrot.slane %v2996_v47, %v3454_v7  ;;  %v1948_v4 = vrot.slane %v2995_v27, %v3454_v7 }
 0x440   : > { %v3019_v20 = vpop.permute.xlu0 %3018  ;;  %v3004_v10 = vpop.permute.xlu1 %3003  ;;  %v2412_v56 = vsel %vm428_vm3, %v1944_v63, %v2411_v12  ;;  %v1972_v49 = vrot.slane %v3010_v6, %v3454_v7  ;;  %v1976_v16 = vrot.slane %v3011_v21, %v3454_v7 }
 0x441   : > { %v3006_v24 = vunpack.i.h.bf16 %v3004_v10  ;;  %v3005_v26 = vunpack.i.l.bf16 %v3004_v10  ;;  %v2413_v31 = vsel %vm430_vm11, %v1948_v4, %v2412_v56  ;;  %v3020_v33 = vunpack.i.l.bf16 %v3019_v20 }
 0x442   : > { %v2414_v36 = vsel %vm432_vm2, %v1952_v17, %v2413_v31  ;;  %v3021_v44 = vunpack.i.h.bf16 %v3019_v20 }
 0x443   : > { %v1964_v22 = vrot.slane %v3005_v26, %v3454_v7  ;;  %v1968_v9 = vrot.slane %v3006_v24, %v3454_v7  ;;  %v2907_v5 = vpack.c.bf16 %v2414_v36, %v2407_v43  ;;  %v1992_v18 = vrot.slane %v3020_v33, %v3454_v7 }
 0x444   : > { %v3029_v14 = vpop.permute.xlu0 %3028  ;;  %v3014_v35 = vpop.permute.xlu1 %3013  ;;  %v1996_v19 = vrot.slane %v3021_v44, %v3454_v7 }
 0x445   : > { %v2416_v40 = vsel %vm422_vm15, %v1964_v22, %v2415_v32  ;;  %v3016_v41 = vunpack.i.h.bf16 %v3014_v35  ;;  %2909 = vmatpush3.bf16.xpose.msk.msra.mxu0 %vm4076_vm7, %v2907_v5  ;;  %v3015_v53 = vunpack.i.l.bf16 %v3014_v35  ;;  %v3030_v54 = vunpack.i.l.bf16 %v3029_v14 }
 0x446   : > { %v2417_v59 = vsel %vm424_vm0, %v1968_v9, %v2416_v40  ;;  %2910 = vmatprep.subr.bf16.mxu0 %v3304_v34  ;;  %v3031_v30 = vunpack.i.h.bf16 %v3029_v14 }
 0x447   : > { %v1988_v45 = vrot.slane %v3016_v41, %v3454_v7  ;;  %v2418_v25 = vsel %vm426_vm1, %v1972_v49, %v2417_v59  ;;  %v1980_v61 = vrot.slane %v3015_v53, %v3454_v7  ;;  %v2008_v23 = vrot.slane %v3030_v54, %v3454_v7 }
 0x448   : > { %v3039_v46 = vpop.permute.xlu0 %3038  ;;  %v3024_v48 = vpop.permute.xlu1 %3023  ;;  %v2419_v38 = vsel %vm428_vm3, %v1976_v16, %v2418_v25  ;;  %v2012_v2 = vrot.slane %v3031_v30, %v3454_v7 }
 0x449   : > { %v3026_v51 = vunpack.i.h.bf16 %v3024_v48  ;;  %v2422_v55 = vsel %vm420_vm14, %v1992_v18, %v1988_v45  ;;  %v3025_v15 = vunpack.i.l.bf16 %v3024_v48  ;;  %v3041_v11 = vunpack.i.h.bf16 %v3039_v46 }
 0x44a   : > { %v2423_v62 = vsel %vm422_vm15, %v1996_v19, %v2422_v55  ;;  %v3040_v47 = vunpack.i.l.bf16 %v3039_v46  ;;  %v2420_v0 = vsel %vm430_vm11, %v1980_v61, %v2419_v38 }
 0x44b   : > { %v2004_v42 = vrot.slane %v3026_v51, %v3454_v7  ;;  %v2000_v39 = vrot.slane %v3025_v15, %v3454_v7  ;;  %v2024_v28 = vrot.slane %v3041_v11, %v3454_v7 }
 0x44c   : > { %v3049_v57 = vpop.permute.xlu0 %3048  ;;  %v3034_v58 = vpop.permute.xlu1 %3033  ;;  %v2020_v31 = vrot.slane %v3040_v47, %v3454_v7 }
 0x44d   : > { %v3036_v29 = vunpack.i.h.bf16 %v3034_v58  ;;  %v2424_v63 = vsel %vm424_vm0, %v2000_v39, %v2423_v62  ;;  %v3035_v1 = vunpack.i.l.bf16 %v3034_v58  ;;  %v3051_v17 = vunpack.i.h.bf16 %v3049_v57 }
 0x44e   : > { %v2425_v3 = vsel %vm426_vm1, %v2004_v42, %v2424_v63  ;;  %v3050_v4 = vunpack.i.l.bf16 %v3049_v57  ;;  %v2429_v45 = vsel %vm420_vm14, %v2024_v28, %v2020_v31 }
 0x44f   : > { %v2016_v8 = vrot.slane %v3036_v29, %v3454_v7  ;;  %v2426_v27 = vsel %vm428_vm3, %v2008_v23, %v2425_v3  ;;  %v1984_v52 = vrot.slane %v3035_v1, %v3454_v7  ;;  %v2060_v6 = vrot.slane %v3051_v17, %v3454_v7 }
 0x450   : > { %v3059_v12 = vpop.permute.xlu0 %3058  ;;  %v3044_v13 = vpop.permute.xlu1 %3043  ;;  %v2427_v20 = vsel %vm430_vm11, %v2012_v2, %v2426_v27  ;;  %v2028_v14 = vrot.slane %v3050_v4, %v3454_v7 }
 0x451   : > { %v2421_v10 = vsel %vm432_vm2, %v1984_v52, %v2420_v0  ;;  %v2428_v56 = vsel %vm432_vm2, %v2016_v8, %v2427_v20  ;;  %v3046_v60 = vunpack.i.h.bf16 %v3044_v13  ;;  %v3045_v24 = vunpack.i.l.bf16 %v3044_v13 }
 0x452   : > { %v2911_v26 = vpack.c.bf16 %v2428_v56, %v2421_v10  ;;  %v3061_v41 = vunpack.i.h.bf16 %v3059_v12  ;;  %v3060_v43 = vunpack.i.l.bf16 %v3059_v12  ;;  %v2430_v59 = vsel %vm422_vm15, %v2028_v14, %v2429_v45 }
 0x453   : > { %v2056_v22 = vrot.slane %v3046_v60, %v3454_v7  ;;  %v2052_v32 = vrot.slane %v3045_v24, %v3454_v7 }
 0x454   : > { %v3069_v33 = vpop.permute.xlu0 %3068  ;;  %v3054_v9 = vpop.permute.xlu1 %3053  ;;  %2913 = vmatpush3.bf16.xpose.msk.msra.mxu0 %vm4076_vm7, %v2911_v26  ;;  %v2068_v55 = vrot.slane %v3061_v41, %v3454_v7  ;;  %v2036_v15 = vrot.slane %v3060_v43, %v3454_v7 }
 0x455   : > { %v3056_v35 = vunpack.i.h.bf16 %v3054_v9  ;;  %v3055_v36 = vunpack.i.l.bf16 %v3054_v9  ;;  %v2436_v40 = vsel %vm420_vm14, %v2056_v22, %v2052_v32  ;;  %2914 = vmatprep.subr.bf16.mxu0 %v3304_v34  ;;  %v3071_v46 = vunpack.i.h.bf16 %v3069_v33 }
 0x456   : > { %v2437_v48 = vsel %vm422_vm15, %v2060_v6, %v2436_v40  ;;  %v3070_v19 = vunpack.i.l.bf16 %v3069_v33 }
 0x457   : > { %v2064_v5 = vrot.slane %v3056_v35, %v3454_v7  ;;  %v2032_v44 = vrot.slane %v3055_v36, %v3454_v7  ;;  %v2076_v61 = vrot.slane %v3071_v46, %v3454_v7 }
 0x458   : > { %v3079_v21 = vpop.permute.xlu0 %3078  ;;  %v3064_v18 = vpop.permute.xlu1 %3063  ;;  %v2044_v38 = vrot.slane %v3070_v19, %v3454_v7 }
 0x459   : > { %v2431_v49 = vsel %vm424_vm0, %v2032_v44, %v2430_v59  ;;  %v2438_v53 = vsel %vm424_vm0, %v2064_v5, %v2437_v48  ;;  %v3066_v51 = vunpack.i.h.bf16 %v3064_v18  ;;  %v3065_v54 = vunpack.i.l.bf16 %v3064_v18 }
 0x45a   : > { %v2432_v39 = vsel %vm426_vm1, %v2036_v15, %v2431_v49  ;;  %v2439_v57 = vsel %vm426_vm1, %v2068_v55, %v2438_v53  ;;  %v3081_v1 = vunpack.i.h.bf16 %v3079_v21  ;;  %v3080_v2 = vunpack.i.l.bf16 %v3079_v21 }
 0x45b   : > { %v2072_v25 = vrot.slane %v3066_v51, %v3454_v7  ;;  %v2040_v30 = vrot.slane %v3065_v54, %v3454_v7 }
 0x45c   : > { %v3089_v42 = vpop.permute.xlu0 %3088  ;;  %v3074_v16 = vpop.permute.xlu1 %3073  ;;  %v2088_v10 = vrot.slane %v3081_v1, %v3454_v7  ;;  %v2084_v56 = vrot.slane %v3080_v2, %v3454_v7 }
 0x45d   : > { %v3076_v58 = vunpack.i.h.bf16 %v3074_v16  ;;  %v2433_v62 = vsel %vm428_vm3, %v2040_v30, %v2432_v39  ;;  %v2440_v29 = vsel %vm428_vm3, %v2072_v25, %v2439_v57  ;;  %v3075_v23 = vunpack.i.l.bf16 %v3074_v16 }
 0x45e   : > { %v2441_v8 = vsel %vm430_vm11, %v2076_v61, %v2440_v29  ;;  %v3090_v27 = vunpack.i.l.bf16 %v3089_v42  ;;  %v2434_v52 = vsel %vm430_vm11, %v2044_v38, %v2433_v62  ;;  %v3091_v13 = vunpack.i.h.bf16 %v3089_v42 }
 0x45f   : > { %v2080_v63 = vrot.slane %v3076_v58, %v3454_v7  ;;  %v2048_v3 = vrot.slane %v3075_v23, %v3454_v7  ;;  %v2443_v40 = vsel %vm420_vm14, %v2088_v10, %v2084_v56 }
 0x460   : > { %v3099_v11 = vpop.permute.xlu0 %3098  ;;  %v3084_v47 = vpop.permute.xlu1 %3083  ;;  %v2092_v31 = vrot.slane %v3090_v27, %v3454_v7  ;;  %v2124_v33 = vrot.slane %v3091_v13, %v3454_v7 }
 0x461   : > { %v2442_v12 = vsel %vm432_vm2, %v2080_v63, %v2441_v8  ;;  %v2435_v0 = vsel %vm432_vm2, %v2048_v3, %v2434_v52  ;;  %v3086_v17 = vunpack.i.h.bf16 %v3084_v47  ;;  %v3085_v4 = vunpack.i.l.bf16 %v3084_v47 }
 0x462   : > { %v2915_v20 = vpack.c.bf16 %v2442_v12, %v2435_v0  ;;  %v3101_v14 = vunpack.i.h.bf16 %v3099_v11  ;;  %v3100_v35 = vunpack.i.l.bf16 %v3099_v11  ;;  %v2444_v5 = vsel %vm422_vm15, %v2092_v31, %v2443_v40 }
 0x463   : > { %v2120_v60 = vrot.slane %v3086_v17, %v3454_v7  ;;  %v2116_v24 = vrot.slane %v3085_v4, %v3454_v7 }
 0x464   : > { %v3109_v26 = vpop.permute.xlu0 %3108  ;;  %v3094_v28 = vpop.permute.xlu1 %3093  ;;  %2917 = vmatpush3.bf16.xpose.msk.msra.mxu0 %vm4076_vm7, %v2915_v20  ;;  %v2132_v48 = vrot.slane %v3101_v14, %v3454_v7  ;;  %v2100_v49 = vrot.slane %v3100_v35, %v3454_v7 }
 0x465   : > { %v3096_v22 = vunpack.i.h.bf16 %v3094_v28  ;;  %v3095_v32 = vunpack.i.l.bf16 %v3094_v28  ;;  %v2450_v9 = vsel %vm420_vm14, %v2120_v60, %v2116_v24  ;;  %2918 = vmatprep.subr.bf16.mxu0 %v3304_v34  ;;  %v3111_v44 = vunpack.i.h.bf16 %v3109_v26 }
 0x466   : > { %v2451_v45 = vsel %vm422_vm15, %v2124_v33, %v2450_v9  ;;  %v3110_v53 = vunpack.i.l.bf16 %v3109_v26 }
 0x467   : > { %v2128_v36 = vrot.slane %v3096_v22, %v3454_v7  ;;  %v2096_v6 = vrot.slane %v3095_v32, %v3454_v7  ;;  %v2140_v42 = vrot.slane %v3111_v44, %v3454_v7 }
 0x468   : > { %v3119_v41 = vpop.permute.xlu0 %3118  ;;  %v3104_v43 = vpop.permute.xlu1 %3103  ;;  %v2108_v58 = vrot.slane %v3110_v53, %v3454_v7 }
 0x469   : > { %v2445_v21 = vsel %vm424_vm0, %v2096_v6, %v2444_v5  ;;  %v2452_v18 = vsel %vm424_vm0, %v2128_v36, %v2451_v45  ;;  %v3106_v59 = vunpack.i.h.bf16 %v3104_v43  ;;  %v3105_v46 = vunpack.i.l.bf16 %v3104_v43 }
 0x46a   : > { %v2446_v19 = vsel %vm426_vm1, %v2100_v49, %v2445_v21  ;;  %v2453_v25 = vsel %vm426_vm1, %v2132_v48, %v2452_v18  ;;  %v3121_v62 = vunpack.i.h.bf16 %v3119_v41  ;;  %v3120_v29 = vunpack.i.l.bf16 %v3119_v41 }
 0x46b   : > { %v2136_v51 = vrot.slane %v3106_v59, %v3454_v7  ;;  %v2104_v54 = vrot.slane %v3105_v46, %v3454_v7 }
 0x46c   : > { %v3129_v55 = vpop.permute.xlu0 %3128  ;;  %v3114_v15 = vpop.permute.xlu1 %3113  ;;  %v2152_v13 = vrot.slane %v3121_v62, %v3454_v7  ;;  %v2148_v0 = vrot.slane %v3120_v29, %v3454_v7 }
 0x46d   : > { %v3116_v30 = vunpack.i.h.bf16 %v3114_v15  ;;  %v2447_v16 = vsel %vm428_vm3, %v2104_v54, %v2446_v19  ;;  %v2454_v39 = vsel %vm428_vm3, %v2136_v51, %v2453_v25  ;;  %v3115_v57 = vunpack.i.l.bf16 %v3114_v15 }
 0x46e   : > { %v2455_v38 = vsel %vm430_vm11, %v2140_v42, %v2454_v39  ;;  %v3130_v2 = vunpack.i.l.bf16 %v3129_v55  ;;  %v2448_v3 = vsel %vm430_vm11, %v2108_v58, %v2447_v16  ;;  %v3131_v11 = vunpack.i.h.bf16 %v3129_v55 }
 0x46f   : > { %v2144_v61 = vrot.slane %v3116_v30, %v3454_v7  ;;  %v2112_v23 = vrot.slane %v3115_v57, %v3454_v7  ;;  %v2457_v9 = vsel %vm420_vm14, %v2152_v13, %v2148_v0 }
 0x470   : > { %v3139_v63 = vpop.permute.xlu0 %3138  ;;  %v3124_v1 = vpop.permute.xlu1 %3123  ;;  %v2156_v56 = vrot.slane %v3130_v2, %v3454_v7  ;;  %v2188_v26 = vrot.slane %v3131_v11, %v3454_v7 }
 0x471   : > { %v2456_v8 = vsel %vm432_vm2, %v2144_v61, %v2455_v38  ;;  %v2449_v47 = vsel %vm432_vm2, %v2112_v23, %v2448_v3  ;;  %v3126_v27 = vunpack.i.h.bf16 %v3124_v1  ;;  %v3125_v52 = vunpack.i.l.bf16 %v3124_v1 }
 0x472   : > { %v2919_v12 = vpack.c.bf16 %v2456_v8, %v2449_v47  ;;  %v3141_v31 = vunpack.i.h.bf16 %v3139_v63  ;;  %v3140_v22 = vunpack.i.l.bf16 %v3139_v63  ;;  %v2458_v36 = vsel %vm422_vm15, %v2156_v56, %v2457_v9 }
 0x473   : > { %v2184_v17 = vrot.slane %v3126_v27, %v3454_v7  ;;  %v2180_v4 = vrot.slane %v3125_v52, %v3454_v7 }
 0x474   : > { %v3149_v20 = vpop.permute.xlu0 %3148  ;;  %v3134_v10 = vpop.permute.xlu1 %3133  ;;  %2921 = vmatpush3.bf16.xpose.msk.msra.mxu0 %vm4076_vm7, %v2919_v12  ;;  %v2196_v45 = vrot.slane %v3141_v31, %v3454_v7  ;;  %v2164_v21 = vrot.slane %v3140_v22, %v3454_v7 }
 0x475   : > { %v3136_v60 = vunpack.i.h.bf16 %v3134_v10  ;;  %v3135_v24 = vunpack.i.l.bf16 %v3134_v10  ;;  %v2464_v28 = vsel %vm420_vm14, %v2184_v17, %v2180_v4  ;;  %2922 = vmatprep.subr.bf16.mxu0 %v3304_v34  ;;  %v3151_v6 = vunpack.i.h.bf16 %v3149_v20 }
 0x476   : > { %v2465_v40 = vsel %vm422_vm15, %v2188_v26, %v2464_v28  ;;  %v3150_v18 = vunpack.i.l.bf16 %v3149_v20 }
 0x477   : > { %v2192_v32 = vrot.slane %v3136_v60, %v3454_v7  ;;  %v2160_v33 = vrot.slane %v3135_v24, %v3454_v7  ;;  %v2204_v55 = vrot.slane %v3151_v6, %v3454_v7 }
 0x478   : > { %v3159_v14 = vpop.permute.xlu0 %3158  ;;  %v3144_v35 = vpop.permute.xlu1 %3143  ;;  %v2172_v30 = vrot.slane %v3150_v18, %v3454_v7 }
 0x479   : > { %v2459_v41 = vsel %vm424_vm0, %v2160_v33, %v2458_v36  ;;  %v2466_v43 = vsel %vm424_vm0, %v2192_v32, %v2465_v40  ;;  %v3146_v5 = vunpack.i.h.bf16 %v3144_v35  ;;  %v3145_v44 = vunpack.i.l.bf16 %v3144_v35 }
 0x47a   : > { %v2460_v53 = vsel %vm426_vm1, %v2164_v21, %v2459_v41  ;;  %v2467_v51 = vsel %vm426_vm1, %v2196_v45, %v2466_v43  ;;  %v3161_v16 = vunpack.i.h.bf16 %v3159_v14  ;;  %v3160_v39 = vunpack.i.l.bf16 %v3159_v14 }
 0x47b   : > { %v2200_v59 = vrot.slane %v3146_v5, %v3454_v7  ;;  %v2168_v46 = vrot.slane %v3145_v44, %v3454_v7 }
 0x47c   : > { %v3169_v48 = vpop.permute.xlu0 %3168  ;;  %v3154_v49 = vpop.permute.xlu1 %3153  ;;  %v2216_v11 = vrot.slane %v3161_v16, %v3454_v7  ;;  %v2212_v47 = vrot.slane %v3160_v39, %v3454_v7 }
 0x47d   : > { %v3156_v54 = vunpack.i.h.bf16 %v3154_v49  ;;  %v2461_v15 = vsel %vm428_vm3, %v2168_v46, %v2460_v53  ;;  %v2468_v19 = vsel %vm428_vm3, %v2200_v59, %v2467_v51  ;;  %v3155_v25 = vunpack.i.l.bf16 %v3154_v49 }
 0x47e   : > { %v2469_v58 = vsel %vm430_vm11, %v2204_v55, %v2468_v19  ;;  %v3170_v29 = vunpack.i.l.bf16 %v3169_v48  ;;  %v2462_v23 = vsel %vm430_vm11, %v2172_v30, %v2461_v15  ;;  %v3171_v63 = vunpack.i.h.bf16 %v3169_v48 }
 0x47f   : > { %v2208_v42 = vrot.slane %v3156_v54, %v3454_v7  ;;  %v2176_v57 = vrot.slane %v3155_v25, %v3454_v7  ;;  %v2471_v28 = vsel %vm420_vm14, %v2216_v11, %v2212_v47 }
 0x480   : > { %v3179_v61 = vpop.permute.xlu0 %3178  ;;  %v3164_v62 = vpop.permute.xlu1 %3163  ;;  %v2220_v0 = vrot.slane %v3170_v29, %v3454_v7  ;;  %v2252_v20 = vrot.slane %v3171_v63, %v3454_v7 }
 0x481   : > { %v2470_v38 = vsel %vm432_vm2, %v2208_v42, %v2469_v58  ;;  %v2463_v1 = vsel %vm432_vm2, %v2176_v57, %v2462_v23  ;;  %v3166_v2 = vunpack.i.h.bf16 %v3164_v62  ;;  %v3165_v3 = vunpack.i.l.bf16 %v3164_v62 }
 0x482   : > { %v2923_v8 = vpack.c.bf16 %v2470_v38, %v2463_v1  ;;  %v3181_v56 = vunpack.i.h.bf16 %v3179_v61  ;;  %v3180_v60 = vunpack.i.l.bf16 %v3179_v61  ;;  %v2472_v32 = vsel %vm422_vm15, %v2220_v0, %v2471_v28 }
 0x483   : > { %v2248_v27 = vrot.slane %v3166_v2, %v3454_v7  ;;  %v2244_v52 = vrot.slane %v3165_v3, %v3454_v7 }
 0x484   : > { %v3189_v12 = vpop.permute.xlu0 %3188  ;;  %v3174_v13 = vpop.permute.xlu1 %3173  ;;  %2925 = vmatpush3.bf16.xpose.msk.msra.mxu0 %vm4076_vm7, %v2923_v8  ;;  %v2260_v40 = vrot.slane %v3181_v56, %v3454_v7  ;;  %v2228_v41 = vrot.slane %v3180_v60, %v3454_v7 }
 0x485   : > { %v3176_v17 = vunpack.i.h.bf16 %v3174_v13  ;;  %v3175_v4 = vunpack.i.l.bf16 %v3174_v13  ;;  %v2478_v10 = vsel %vm420_vm14, %v2248_v27, %v2244_v52  ;;  %2926 = vmatprep.subr.bf16.mxu0 %v3304_v34  ;;  %v3191_v33 = vunpack.i.h.bf16 %v3189_v12 }
 0x486   : > { %v2479_v9 = vsel %vm422_vm15, %v2252_v20, %v2478_v10  ;;  %v3190_v43 = vunpack.i.l.bf16 %v3189_v12 }
 0x487   : > { %v2256_v24 = vrot.slane %v3176_v17, %v3454_v7  ;;  %v2224_v26 = vrot.slane %v3175_v4, %v3454_v7  ;;  %v2268_v48 = vrot.slane %v3191_v33, %v3454_v7 }
 0x488   : > { %v3199_v31 = vpop.permute.xlu0 %3198  ;;  %v3184_v22 = vpop.permute.xlu1 %3183  ;;  %v2236_v54 = vrot.slane %v3190_v43, %v3454_v7 }
 0x489   : > { %v2473_v14 = vsel %vm424_vm0, %v2224_v26, %v2472_v32  ;;  %v2480_v35 = vsel %vm424_vm0, %v2256_v24, %v2479_v9  ;;  %v3186_v36 = vunpack.i.h.bf16 %v3184_v22  ;;  %v3185_v6 = vunpack.i.l.bf16 %v3184_v22 }
 0x48a   : > { %v2474_v18 = vsel %vm426_vm1, %v2228_v41, %v2473_v14  ;;  %v2481_v59 = vsel %vm426_vm1, %v2260_v40, %v2480_v35  ;;  %v3201_v15 = vunpack.i.h.bf16 %v3199_v31  ;;  %v3200_v19 = vunpack.i.l.bf16 %v3199_v31 }
 0x48b   : > { %v2264_v5 = vrot.slane %v3186_v36, %v3454_v7  ;;  %v2232_v44 = vrot.slane %v3185_v6, %v3454_v7 }
 0x48c   : > { %v3209_v45 = vpop.permute.xlu0 %3208  ;;  %v3194_v21 = vpop.permute.xlu1 %3193  ;;  %v2280_v63 = vrot.slane %v3201_v15, %v3454_v7  ;;  %v2276_v1 = vrot.slane %v3200_v19, %v3454_v7 }
 0x48d   : > { %v3196_v46 = vunpack.i.h.bf16 %v3194_v21  ;;  %v2475_v49 = vsel %vm428_vm3, %v2232_v44, %v2474_v18  ;;  %v2482_v53 = vsel %vm428_vm3, %v2264_v5, %v2481_v59  ;;  %v3195_v51 = vunpack.i.l.bf16 %v3194_v21 }
 0x48e   : > { %v2483_v30 = vsel %vm430_vm11, %v2268_v48, %v2482_v53  ;;  %v3210_v39 = vunpack.i.l.bf16 %v3209_v45  ;;  %v2476_v57 = vsel %vm430_vm11, %v2236_v54, %v2475_v49  ;;  %v3211_v61 = vunpack.i.h.bf16 %v3209_v45 }
 0x48f   : > { %v2272_v55 = vrot.slane %v3196_v46, %v3454_v7  ;;  %v2240_v25 = vrot.slane %v3195_v51, %v3454_v7  ;;  %v2485_v10 = vsel %vm420_vm14, %v2280_v63, %v2276_v1 }
 0x490   : > { %v3219_v42 = vpop.permute.xlu0 %3218  ;;  %v3204_v16 = vpop.permute.xlu1 %3203  ;;  %v2284_v47 = vrot.slane %v3210_v39, %v3454_v7  ;;  %v2316_v12 = vrot.slane %v3211_v61, %v3454_v7 }
 0x491   : > { %v2484_v58 = vsel %vm432_vm2, %v2272_v55, %v2483_v30  ;;  %v2477_v62 = vsel %vm432_vm2, %v2240_v25, %v2476_v57  ;;  %v3206_v29 = vunpack.i.h.bf16 %v3204_v16  ;;  %v3205_v23 = vunpack.i.l.bf16 %v3204_v16 }
 0x492   : > { %v2927_v38 = vpack.c.bf16 %v2484_v58, %v2477_v62  ;;  %v3221_v0 = vunpack.i.h.bf16 %v3219_v42  ;;  %v3220_v17 = vunpack.i.l.bf16 %v3219_v42  ;;  %v2486_v24 = vsel %vm422_vm15, %v2284_v47, %v2485_v10 }
 0x493   : > { %v2312_v2 = vrot.slane %v3206_v29, %v3454_v7  ;;  %v2308_v3 = vrot.slane %v3205_v23, %v3454_v7 }
 0x494   : > { %v3229_v8 = vpop.permute.xlu0 %3228  ;;  %v3214_v11 = vpop.permute.xlu1 %3213  ;;  %2929 = vmatpush3.bf16.xpose.msk.msra.mxu0 %vm4076_vm7, %v2927_v38  ;;  %v2324_v9 = vrot.slane %v3221_v0, %v3454_v7  ;;  %v2292_v14 = vrot.slane %v3220_v17, %v3454_v7 }
 0x495   : > { %v3216_v27 = vunpack.i.h.bf16 %v3214_v11  ;;  %v3215_v52 = vunpack.i.l.bf16 %v3214_v11  ;;  %v2492_v13 = vsel %vm420_vm14, %v2312_v2, %v2308_v3  ;;  %2930 = vmatprep.subr.bf16.mxu0 %v3304_v34  ;;  %v3231_v26 = vunpack.i.h.bf16 %v3229_v8 }
 0x496   : > { %v2493_v28 = vsel %vm422_vm15, %v2316_v12, %v2492_v13  ;;  %v3230_v35 = vunpack.i.l.bf16 %v3229_v8 }
 0x497   : > { %v2320_v4 = vrot.slane %v3216_v27, %v3454_v7  ;;  %v2288_v20 = vrot.slane %v3215_v52, %v3454_v7  ;;  %v2332_v45 = vrot.slane %v3231_v26, %v3454_v7 }
 0x498   : > { %v3239_v56 = vpop.permute.xlu0 %3238  ;;  %v3224_v60 = vpop.permute.xlu1 %3223  ;;  %v2300_v46 = vrot.slane %v3230_v35, %v3454_v7 }
 0x499   : > { %v2487_v31 = vsel %vm424_vm0, %v2288_v20, %v2486_v24  ;;  %v2494_v22 = vsel %vm424_vm0, %v2320_v4, %v2493_v28  ;;  %v3226_v32 = vunpack.i.h.bf16 %v3224_v60  ;;  %v3225_v33 = vunpack.i.l.bf16 %v3224_v60 }
 0x49a   : > { %v2488_v43 = vsel %vm426_vm1, %v2292_v14, %v2487_v31  ;;  %v2495_v5 = vsel %vm426_vm1, %v2324_v9, %v2494_v22  ;;  %v3241_v48 = vunpack.i.h.bf16 %v3239_v56  ;;  %v3240_v49 = vunpack.i.l.bf16 %v3239_v56 }
 0x49b   : > { %v2328_v36 = vrot.slane %v3226_v32, %v3454_v7  ;;  %v2296_v6 = vrot.slane %v3225_v33, %v3454_v7 }
 0x49c   : > { %v3249_v40 = vpop.permute.xlu0 %3248  ;;  %v3234_v41 = vpop.permute.xlu1 %3233  ;;  %v2344_v58 = vrot.slane %v3241_v48, %v3454_v7  ;;  %v2340_v61 = vrot.slane %v3240_v49, %v3454_v7 }
 0x49d   : > { %v3236_v44 = vunpack.i.h.bf16 %v3234_v41  ;;  %v2489_v21 = vsel %vm428_vm3, %v2296_v6, %v2488_v43  ;;  %v2496_v18 = vsel %vm428_vm3, %v2328_v36, %v2495_v5  ;;  %v3235_v59 = vunpack.i.l.bf16 %v3234_v41 }
 0x49e   : > { %v3250_v51 = vunpack.i.l.bf16 %v3249_v40  ;;  %v2497_v55 = vsel %vm430_vm11, %v2332_v45, %v2496_v18  ;;  %v2490_v19 = vsel %vm430_vm11, %v2300_v46, %v2489_v21  ;;  %v3251_v42 = vunpack.i.h.bf16 %v3249_v40 }
 0x49f   : > { %v2336_v53 = vrot.slane %v3236_v44, %v3454_v7  ;;  %v2304_v54 = vrot.slane %v3235_v59, %v3454_v7  ;;  %v2499_v27 = vsel %vm420_vm14, %v2344_v58, %v2340_v61 }
 0x4a0   : > { %v3244_v15 = vpop.permute.xlu1 %3243  ;;  %v3259_v30 = vpop.permute.xlu0 %3258  ;;  %v2348_v29 = vrot.slane %v3250_v51, %v3454_v7  ;;  %v2380_v3 = vrot.slane %v3251_v42, %v3454_v7 }
 0x4a1   : > { %v2498_v25 = vsel %vm432_vm2, %v2336_v53, %v2497_v55  ;;  %v2491_v16 = vsel %vm432_vm2, %v2304_v54, %v2490_v19  ;;  %v3246_v39 = vunpack.i.h.bf16 %v3244_v15  ;;  %v3245_v57 = vunpack.i.l.bf16 %v3244_v15 }
 0x4a2   : > { %v2931_v62 = vpack.c.bf16 %v2498_v25, %v2491_v16  ;;  %v3261_v8 = vunpack.i.h.bf16 %v3259_v30  ;;  %v3260_v11 = vunpack.i.l.bf16 %v3259_v30  ;;  %v2500_v0 = vsel %vm422_vm15, %v2348_v29, %v2499_v27 }
 0x4a3   : > { %v2376_v23 = vrot.slane %v3246_v39, %v3454_v7  ;;  %v2372_v38 = vrot.slane %v3245_v57, %v3454_v7 }
 0x4a4   : > { %v3254_v63 = vpop.permute.xlu1 %3253  ;;  %2933 = vmatpush3.bf16.xpose.msk.msra.mxu0 %vm4076_vm7, %v2931_v62  ;;  %v3269_v52 = vpop.permute.xlu0 %3268  ;;  %v2356_v24 = vrot.slane %v3260_v11, %v3454_v7 }
 0x4a5   : > { %v3256_v1 = vunpack.i.h.bf16 %v3254_v63  ;;  %v3255_v2 = vunpack.i.l.bf16 %v3254_v63  ;;  %v2506_v47 = vsel %vm420_vm14, %v2376_v23, %v2372_v38  ;;  %2934 = vmatprep.subr.bf16.mxu0 %v3304_v34  ;;  %v2388_v34 = vrot.slane %v3261_v8, %v3454_v7 }
 0x4a6   : > { %v2507_v17 = vsel %vm422_vm15, %v2380_v3, %v2506_v47  ;;  %v3271_v26 = vunpack.i.h.bf16 %v3269_v52  ;;  %v3270_v28 = vunpack.i.l.bf16 %v3269_v52 }
 0x4a7   : > { %v2384_v12 = vrot.slane %v3256_v1, %v3454_v7  ;;  %v2352_v13 = vrot.slane %v3255_v2, %v3454_v7 }
 0x4a8   : > { %v3264_v4 = vpop.permute.xlu1 %3263  ;;  %v2396_v40 = vrot.slane %v3271_v26, %v3454_v7  ;;  %v2364_v41 = vrot.slane %v3270_v28, %v3454_v7 }
 0x4a9   : > { %v2501_v20 = vsel %vm424_vm0, %v2352_v13, %v2500_v0  ;;  %v2508_v10 = vsel %vm424_vm0, %v2384_v12, %v2507_v17  ;;  %v3266_v56 = vunpack.i.h.bf16 %v3264_v4  ;;  %v3265_v60 = vunpack.i.l.bf16 %v3264_v4 }
 0x4aa   : > { %v2502_v32 = vsel %vm426_vm1, %v2356_v24, %v2501_v20  ;;  %v2509_v33 = vsel %vm426_vm1, %v2388_v34, %v2508_v10 }
 0x4ab   : > { %v2392_v31 = vrot.slane %v3266_v56, %v3454_v7  ;;  %v2360_v22 = vrot.slane %v3265_v60, %v3454_v7 }
 0x4ac   : > { %v3274_v9 = vpop.permute.xlu1 %3273 }
 0x4ad   : > { %v2503_v14 = vsel %vm428_vm3, %v2360_v22, %v2502_v32  ;;  %v2510_v35 = vsel %vm428_vm3, %v2392_v31, %v2509_v33  ;;  %v3276_v36 = vunpack.i.h.bf16 %v3274_v9  ;;  %v3275_v6 = vunpack.i.l.bf16 %v3274_v9 }
 0x4ae   : > { %v2504_v44 = vsel %vm430_vm11, %v2364_v41, %v2503_v14  ;;  %v2511_v45 = vsel %vm430_vm11, %v2396_v40, %v2510_v35 }
 0x4af   : > { %v2400_v43 = vrot.slane %v3276_v36, %v3454_v7  ;;  %v2368_v5 = vrot.slane %v3275_v6, %v3454_v7 }
 0x4b1   : > { %v2505_v21 = vsel %vm432_vm2, %v2368_v5, %v2504_v44  ;;  %v2512_v18 = vsel %vm432_vm2, %v2400_v43, %v2511_v45 }
 0x4b2   : > { %v2935_v59 = vpack.c.bf16 %v2512_v18, %v2505_v21 }
 0x4b4   : > { %2937 = vmatpush3.bf16.xpose.msk.msra.mxu0 %vm4076_vm7, %v2935_v59 }
 0x4bb   : > { %2904 = vmatmul.mubr.msk.f32.vlgmr.msra.gmra.mrb[0].mxu0 %vm434_vm4, %v3477_v50  ;;  %v2628_v50 = vstv %s2627_s30 }
 0x58e   : > { %v2614_v46 = vpop.f32.mrb[0].mxu0 }
 0x58f   : > { %v2618_v48 = vand.u32 2147483647, %v2614_v46  ;;  %v2938_v49 = vtrunc.f32 %v2614_v46  ;;  %v2905_v7 = vpop.f32.mrb[1].mxu0 }
 0x591   : > { %v2939_v53 = vcvt.f32.s32 %v2938_v49  ;;  %v2619_v51 = vsel %vm420_vm14, %v2618_v48, 0.0 }
 0x592   : > { %2620 = vadd.xlane.f32.xlu0 %v2619_v51 }
 0x593   : > { %2626 = vst [vmem:[%s162_s29] sm:$0x1] %v2939_v53 }
 0x61f   : > { %v2621_v54 = vpop.xlane.xlu0 %2620 }
 0x620   : > { %v2622_v37 = vadd.f32 1e-08, %v2621_v54 }
 0x622   : > { %3277 = vrcp.f32 %v2622_v37 }
 0x62c   : > { %v3278_v55 = vpop.eup %3277 }
 0x62d   : > { %v2624_v15 = vmul.f32 %v3278_v55, %v2618_v48 }
 0x62f   : > { %v2629_v19 = vmul.f32 %v2628_v50, %v2624_v15 }
 0x631   : > { %v2940_v25 = vtrunc.f32 %v2629_v19 }
 0x633   : > { %v2941_v30 = vcvt.f32.s32 %v2940_v25 }
 0x635   : > { %2631 = vst [vmem:[%s162_s29] sm:$0x2] %v2941_v30 }
 0x636 PF: > { %s19_s17 = sadd.s32 1, %s3299_s17  }
 0x637   : > { %p16_p9 = scmp.ge.s32.totalorder %s19_s17, 4  }
 0x639   :  { %18 = sbr.rel (!%p16_p9) target bundleno = 16 (0x10), region = 61 }

</bundles_post_ra>
